<compile_context>
chip_gen: v7x
topology: tpu7x:2x2x1
jax: 0.10.0
libtpu: 0.0.40
codegen_flags: <defaults>
</compile_context>

<pallas_src>
import functools
import math

import jax
import jax.numpy as jnp
from jax.experimental import pallas as pl
from jax.experimental.pallas import tpu as pltpu

# ----------------------------- model config (small, synthetic) -----------------------------
VOCAB = 128
MAX_POS = 64
HIDDEN = 32
N_HEADS = 4
N_LAYERS = 2
LN_EPS = 1e-5


# ----------------------------- fused GPT-2 forward kernel -----------------------------
def _gpt2_forward_kernel(
    ids_ref,     # (N, 1)  int32   flattened input_ids, N = B*S
    wte_ref,     # (V, H)          token embedding
    wpe_ref,     # (P, H)          positional embedding
    wqkv_ref,    # (L, H, 3H)      [wq (pre-scaled by 1/sqrt(hd)) | wk | wv] lane-concat
    bqkv_ref,    # (L, 1, 3H)
    wproj_ref,   # (L, H, H)
    bproj_ref,   # (L, 1, H)
    lnp_ref,     # (L, 4, 1, H)    [ln1_g, ln1_b, ln2_g, ln2_b]
    wfc_ref,     # (L, H, 4H)
    bfc_ref,     # (L, 1, 4H)
    wfo_ref,     # (L, 4H, H)
    bfo_ref,     # (L, 1, H)
    lnf_ref,     # (2, 1, H)       [ln_f_g, ln_f_b]
    lmw_ref,     # (H, V)          tied LM head (wte.T, pre-transposed at init)
    logits_ref,  # (N, V)     out
    *hid_refs,   # optional: (L+1, N, H) out (embeddings, block_1..block_{L-1}, ln_f(block_L))
    batch, seq, num_heads, n_layers, eps, collect_hidden,
):
    f32 = jnp.float32
    V, H = wte_ref.shape
    N = batch * seq
    hd = H // num_heads

    # ---------------- fused embedding: one-hot(ids) @ wte + positional rows ----------------
    ids = ids_ref[...]                                                    # (N, 1) int32
    vocab_iota = jax.lax.broadcasted_iota(jnp.int32, (N, V), 1)           # lane-dense (16,128)
    onehot = (vocab_iota == ids).astype(f32)                              # (N, V)
    pos = jnp.broadcast_to(wpe_ref[0:seq, :].astype(f32)[None],
                           (batch, seq, H)).reshape(N, H)                 # leading-dim reshape
    x = jnp.dot(onehot, wte_ref[...].astype(f32),
                preferred_element_type=f32) + pos                         # (N, H)

    if collect_hidden:
        hid_refs[0][0] = x.astype(hid_refs[0].dtype)

    # Causal additive mask, built once per kernel invocation (kept in f32).
    qi = jax.lax.broadcasted_iota(jnp.int32, (seq, seq), 0)
    ki = jax.lax.broadcasted_iota(jnp.int32, (seq, seq), 1)
    neg_mask = jnp.where(ki <= qi, 0.0, -1e30).astype(f32)[None]          # (1, S, S)

    def ln(v, g, b):
        mu = jnp.mean(v, axis=-1, keepdims=True)
        vc = v - mu
        var = jnp.mean(vc * vc, axis=-1, keepdims=True)
        return vc * jax.lax.rsqrt(var + eps) * g + b

    for l in range(n_layers):                       # static unroll (N_LAYERS is small)
        # ---------------- causal multi-head self-attention ----------------
        h = ln(x, lnp_ref[l, 0], lnp_ref[l, 1])                                       # (N, H)
        qkv = jnp.dot(h, wqkv_ref[l], preferred_element_type=f32) + bqkv_ref[l]       # (N, 3H)
        # leading-dim-only reshapes (N = B*S split at an 8-row tile boundary)
        q3 = qkv[:, 0:H].reshape(batch, seq, H)
        k3 = qkv[:, H:2 * H].reshape(batch, seq, H)
        v3 = qkv[:, 2 * H:3 * H].reshape(batch, seq, H)

        ctxs = []
        for n in range(num_heads):                  # static unroll over the 4 heads
            sl = slice(n * hd, (n + 1) * hd)
            s = jnp.einsum('bqd,bkd->bqk', q3[:, :, sl], k3[:, :, sl],
                           preferred_element_type=f32) + neg_mask                     # (B,S,S)
            s = s - jnp.max(s, axis=-1, keepdims=True)
            p = jnp.exp(s)
            p = p * pl.reciprocal(jnp.sum(p, axis=-1, keepdims=True), approx=True)
            c = jnp.einsum('bqk,bkd->bqd', p, v3[:, :, sl],
                           preferred_element_type=f32)                                # (B,S,hd)
            ctxs.append(c.reshape(N, hd))
        # head-major lane concat -> one c_proj dot + one bias add per layer
        ctx = jnp.concatenate(ctxs, axis=-1)                                          # (N, H)
        x = x + jnp.dot(ctx, wproj_ref[l], preferred_element_type=f32) + bproj_ref[l]

        # ---------------- MLP (gelu_new, tanh approximation) ----------------
        h2 = ln(x, lnp_ref[l, 2], lnp_ref[l, 3])
        fc = jnp.dot(h2, wfc_ref[l], preferred_element_type=f32) + bfc_ref[l]
        fc = 0.5 * fc * (1.0 + jnp.tanh(0.7978845608028654 * (fc + 0.044715 * fc * fc * fc)))
        x = x + jnp.dot(fc, wfo_ref[l], preferred_element_type=f32) + bfo_ref[l]

        if collect_hidden and l < n_layers - 1:
            hid_refs[0][l + 1] = x.astype(hid_refs[0].dtype)

    # ---------------- final LayerNorm + tied LM head ----------------
    xf = ln(x, lnf_ref[0], lnf_ref[1])
    if collect_hidden:
        hid_refs[0][n_layers] = xf.astype(hid_refs[0].dtype)
    logits_ref[...] = jnp.dot(xf, lmw_ref[...],
                              preferred_element_type=f32).astype(logits_ref.dtype)


# ----------------------------- non-affine LayerNorm (extractStates path) -----------------------------
def teacher_layer_norm(x2d, eps=LN_EPS):
    # nn.LayerNorm(hidden_size, elementwise_affine=False).  Plain jnp: a dedicated
    # pallas_call for a (B, H) array is pure launch + DMA overhead, and on the hot path it
    # lives inside the fused kernel anyway (ln_f / ln()).
    mu = jnp.mean(x2d, axis=-1, keepdims=True)
    xc = x2d - mu
    var = jnp.mean(xc * xc, axis=-1, keepdims=True)
    return xc * jax.lax.rsqrt(var + eps)


# ----------------------------- parameter init (deterministic, synthetic) -----------------------------
def init_params(key, vocab, max_pos, H, nh, nlayers):
    hd = H // nh
    std = 0.02
    scale = 1.0 / math.sqrt(hd)      # folded into the W_q slab (and b_q if nonzero) at init
    F = 4 * H
    keys = jax.random.split(key, 2 + nlayers)

    wte = jax.random.normal(keys[0], (vocab, H), jnp.float32) * std

    wqkv, wproj, wfc, wfo = [], [], [], []
    for l in range(nlayers):
        lk = jax.random.split(keys[2 + l], 6)
        wq = jax.random.normal(lk[0], (H, H), jnp.float32) * std * scale   # pre-scaled
        wk = jax.random.normal(lk[1], (H, H), jnp.float32) * std
        wv = jax.random.normal(lk[2], (H, H), jnp.float32) * std
        wqkv.append(jnp.concatenate([wq, wk, wv], axis=-1))                # (H, 3H) lane-concat
        wproj.append(jax.random.normal(lk[3], (H, H), jnp.float32) * std)
        wfc.append(jax.random.normal(lk[4], (H, F), jnp.float32) * std)
        wfo.append(jax.random.normal(lk[5], (F, H), jnp.float32) * std)

    ones = jnp.ones((nlayers, 1, 1, H), jnp.float32)
    zeros = jnp.zeros((nlayers, 1, 1, H), jnp.float32)
    return {
        "wte": wte,
        "lm_w": wte.T,                                   # tied head, transposed ONCE at init
        "wpe": jax.random.normal(keys[1], (max_pos, H), jnp.float32) * std,
        "wqkv": jnp.stack(wqkv),                         # (L, H, 3H)
        # NOTE: if real HF weights are loaded, the first H lanes (b_q) must also be
        # pre-scaled by 1/sqrt(hd); they are zeros here so this is consistent.
        "bqkv": jnp.zeros((nlayers, 1, 3 * H), jnp.float32),
        "wproj": jnp.stack(wproj),                       # (L, H, H)
        "bproj": jnp.zeros((nlayers, 1, H), jnp.float32),
        "lnp": jnp.concatenate([ones, zeros, ones, zeros], axis=1),   # (L, 4, 1, H)
        "wfc": jnp.stack(wfc),                           # (L, H, 4H)
        "bfc": jnp.zeros((nlayers, 1, F), jnp.float32),
        "wfo": jnp.stack(wfo),                           # (L, 4H, H)
        "bfo": jnp.zeros((nlayers, 1, H), jnp.float32),
        "lnf": jnp.stack([jnp.ones((1, H), jnp.float32),
                          jnp.zeros((1, H), jnp.float32)]),            # (2, 1, H)
    }


# ----------------------------- Teacher.forward -----------------------------
@functools.partial(jax.jit, static_argnames=("output_hidden_states",))
def teacher_forward(params, input_ids, output_hidden_states=False):
    """Mirrors GPT2LMHeadModel.forward: returns (logits, hidden_states_or_None).

    hidden_states (HF convention): (embedding_out, block_1_out, ..., block_{L-1}_out,
    ln_f(block_L_out)), i.e. num_layers + 1 entries.
    """
    B, S = input_ids.shape
    H = params["wte"].shape[1]
    L = params["wqkv"].shape[0]
    V = params["lm_w"].shape[1]
    N = B * S

    ids2d = input_ids.reshape(N, 1).astype(jnp.int32)

    args = (ids2d, params["wte"], params["wpe"], params["wqkv"], params["bqkv"],
            params["wproj"], params["bproj"], params["lnp"], params["wfc"],
            params["bfc"], params["wfo"], params["bfo"], params["lnf"], params["lm_w"])

    kernel = functools.partial(_gpt2_forward_kernel, batch=B, seq=S,
                               num_heads=N_HEADS, n_layers=L, eps=LN_EPS,
                               collect_hidden=output_hidden_states)

    def full_spec(a):
        nd = a.ndim
        return pl.BlockSpec(a.shape, lambda i, nd=nd: (0,) * nd)

    in_specs = [full_spec(a) for a in args]
    cparams = pltpu.CompilerParams(dimension_semantics=("arbitrary",))

    if output_hidden_states:
        logits2d, hid = pl.pallas_call(
            kernel,
            out_shape=(jax.ShapeDtypeStruct((N, V), jnp.float32),
                       jax.ShapeDtypeStruct((L + 1, N, H), jnp.float32)),
            grid=(1,),
            in_specs=in_specs,
            out_specs=(pl.BlockSpec((N, V), lambda i: (0, 0)),
                       pl.BlockSpec((L + 1, N, H), lambda i: (0, 0, 0))),
            compiler_params=cparams,
        )(*args)
        logits = logits2d.reshape(B, S, V)
        hidden_states = [hid[i].reshape(B, S, H) for i in range(L + 1)]
        return logits, hidden_states

    # Logits-only variant: no masked 32-lane hidden-state stores, no (L+1,N,H) writeback.
    logits2d = pl.pallas_call(
        kernel,
        out_shape=jax.ShapeDtypeStruct((N, V), jnp.float32),
        grid=(1,),
        in_specs=in_specs,
        out_specs=pl.BlockSpec((N, V), lambda i: (0, 0)),
        compiler_params=cparams,
    )(*args)
    return logits2d.reshape(B, S, V), None

# TODO(synk): tokenizer ops, HF beam-search generation, and the training/eval loops in the
# PyTorch module are host-side orchestration with no Pallas equivalent and are not ported.


if __name__ == "__main__":
    B, S = 2, 8
    key = jax.random.PRNGKey(0)
    kp, kx = jax.random.split(key)

    params = init_params(kp, VOCAB, MAX_POS, HIDDEN, N_HEADS, N_LAYERS)
    input_ids = jax.random.randint(kx, (B, S), 0, VOCAB, dtype=jnp.int32)

    # fast (logits-only) variant and full variant with hidden states
    logits_fast, _ = teacher_forward(params, input_ids, output_hidden_states=False)
    logits, hidden_states = teacher_forward(params, input_ids, output_hidden_states=True)

    # exercise the module's own non-affine LayerNorm (extractStates path) on an extracted state
    z = teacher_layer_norm(hidden_states[0][:, -1, :])

    jax.block_until_ready((logits_fast, logits, hidden_states, z))
    assert logits.shape == (B, S, VOCAB)
    assert logits_fast.shape == (B, S, VOCAB)
    assert bool(jnp.allclose(logits, logits_fast, atol=1e-5, rtol=1e-5))
    assert len(hidden_states) == N_LAYERS + 1
    assert z.shape == (B, HIDDEN)
    print("KERNEL_OK")
</pallas_src>

<mosaic_0001>
module attributes {stable_mosaic.version = 11 : i64} {
  func.func @_gpt2_forward_kernel(%arg0: i32, %arg1: memref<16x1xi32, #tpu.memory_space<vmem>>, %arg2: memref<128x32xf32, #tpu.memory_space<vmem>>, %arg3: memref<64x32xf32, #tpu.memory_space<vmem>>, %arg4: memref<2x32x96xf32, #tpu.memory_space<vmem>>, %arg5: memref<2x1x96xf32, #tpu.memory_space<vmem>>, %arg6: memref<2x32x32xf32, #tpu.memory_space<vmem>>, %arg7: memref<2x1x32xf32, #tpu.memory_space<vmem>>, %arg8: memref<2x4x1x32xf32, #tpu.memory_space<vmem>>, %arg9: memref<2x32x128xf32, #tpu.memory_space<vmem>>, %arg10: memref<2x1x128xf32, #tpu.memory_space<vmem>>, %arg11: memref<2x128x32xf32, #tpu.memory_space<vmem>>, %arg12: memref<2x1x32xf32, #tpu.memory_space<vmem>>, %arg13: memref<2x1x32xf32, #tpu.memory_space<vmem>>, %arg14: memref<32x128xf32, #tpu.memory_space<vmem>>, %arg15: memref<16x128xf32, #tpu.memory_space<vmem>>) attributes {dimension_semantics = [#tpu.dimension_semantics<arbitrary>], iteration_bounds = array<i64: 1>, scalar_prefetch = 0 : i64, scratch_operands = 0 : i64, tpu.core_type = #tpu.core_type<tc>, window_params = [{pipeline_mode = #tpu.pipeline_mode<synchronous>, transform_indices = @transform_0, window_bounds = array<i64: 16, 1>}, {pipeline_mode = #tpu.pipeline_mode<synchronous>, transform_indices = @transform_1, window_bounds = array<i64: 128, 32>}, {pipeline_mode = #tpu.pipeline_mode<synchronous>, transform_indices = @transform_2, window_bounds = array<i64: 64, 32>}, {pipeline_mode = #tpu.pipeline_mode<synchronous>, transform_indices = @transform_3, window_bounds = array<i64: 2, 32, 96>}, {pipeline_mode = #tpu.pipeline_mode<synchronous>, transform_indices = @transform_4, window_bounds = array<i64: 2, 1, 96>}, {pipeline_mode = #tpu.pipeline_mode<synchronous>, transform_indices = @transform_5, window_bounds = array<i64: 2, 32, 32>}, {pipeline_mode = #tpu.pipeline_mode<synchronous>, transform_indices = @transform_6, window_bounds = array<i64: 2, 1, 32>}, {pipeline_mode = #tpu.pipeline_mode<synchronous>, transform_indices = @transform_7, window_bounds = array<i64: 2, 4, 1, 32>}, {pipeline_mode = #tpu.pipeline_mode<synchronous>, transform_indices = @transform_8, window_bounds = array<i64: 2, 32, 128>}, {pipeline_mode = #tpu.pipeline_mode<synchronous>, transform_indices = @transform_9, window_bounds = array<i64: 2, 1, 128>}, {pipeline_mode = #tpu.pipeline_mode<synchronous>, transform_indices = @transform_10, window_bounds = array<i64: 2, 128, 32>}, {pipeline_mode = #tpu.pipeline_mode<synchronous>, transform_indices = @transform_11, window_bounds = array<i64: 2, 1, 32>}, {pipeline_mode = #tpu.pipeline_mode<synchronous>, transform_indices = @transform_12, window_bounds = array<i64: 2, 1, 32>}, {pipeline_mode = #tpu.pipeline_mode<synchronous>, transform_indices = @transform_13, window_bounds = array<i64: 32, 128>}, {pipeline_mode = #tpu.pipeline_mode<synchronous>, transform_indices = @transform_14, window_bounds = array<i64: 16, 128>}]} {
    %c0 = arith.constant 0 : index
    %c0_0 = arith.constant 0 : index
    %0 = vector.load %arg1[%c0, %c0_0] : memref<16x1xi32, #tpu.memory_space<vmem>>, vector<16x1xi32>
    %1 = tpu.iota {dimensions = array<i32: 1>} : vector<16x128xi32>
    %2 = vector.broadcast %0 : vector<16x1xi32> to vector<16x128xi32>
    %3 = arith.cmpi eq, %1, %2 : vector<16x128xi32>
    %4 = arith.extui %3 : vector<16x128xi1> to vector<16x128xi32>
    %5 = arith.sitofp %4 : vector<16x128xi32> to vector<16x128xf32>
    %c0_1 = arith.constant 0 : index
    %c0_2 = arith.constant 0 : index
    %6 = vector.load %arg3[%c0_1, %c0_2] : memref<64x32xf32, #tpu.memory_space<vmem>>, vector<8x32xf32>
    %7 = vector.shape_cast %6 : vector<8x32xf32> to vector<1x8x32xf32>
    %8 = vector.shape_cast %7 : vector<1x8x32xf32> to vector<1x8x32xf32>
    %9 = vector.broadcast %8 : vector<1x8x32xf32> to vector<2x8x32xf32>
    %10 = vector.shape_cast %9 : vector<2x8x32xf32> to vector<16x32xf32>
    %c0_3 = arith.constant 0 : index
    %c0_4 = arith.constant 0 : index
    %11 = vector.load %arg2[%c0_3, %c0_4] : memref<128x32xf32, #tpu.memory_space<vmem>>, vector<128x32xf32>
    %cst = arith.constant dense<0.000000e+00> : vector<16x32xf32>
    %12 = tpu.matmul %5, %11, %cst {dimension_numbers = #tpu.dot_dimension_numbers<[1], [0], [0], [1], [0, 0, 1, 1], [], []>} : vector<16x128xf32>, vector<128x32xf32>, vector<16x32xf32> -> vector<16x32xf32>
    %13 = arith.addf %12, %10 : vector<16x32xf32>
    %14 = tpu.iota {dimensions = array<i32: 0>} : vector<8x8xi32>
    %15 = tpu.iota {dimensions = array<i32: 1>} : vector<8x8xi32>
    %16 = arith.cmpi sle, %15, %14 : vector<8x8xi32>
    %cst_5 = arith.constant 0.000000e+00 : f32
    %cst_6 = arith.constant -1.000000e+30 : f32
    %17 = vector.broadcast %cst_5 : f32 to vector<8x8xf32>
    %18 = vector.broadcast %cst_6 : f32 to vector<8x8xf32>
    %19 = arith.select %16, %17, %18 : vector<8x8xi1>, vector<8x8xf32>
    %20 = vector.shape_cast %19 : vector<8x8xf32> to vector<1x8x8xf32>
    %c0_7 = arith.constant 0 : index
    %c0_8 = arith.constant 0 : index
    %c0_9 = arith.constant 0 : index
    %c0_10 = arith.constant 0 : index
    %21 = vector.load %arg8[%c0_7, %c0_8, %c0_9, %c0_10] : memref<2x4x1x32xf32, #tpu.memory_space<vmem>>, vector<1x1x1x32xf32>
    %22 = vector.shape_cast %21 : vector<1x1x1x32xf32> to vector<1x32xf32>
    %c0_11 = arith.constant 0 : index
    %c1 = arith.constant 1 : index
    %c0_12 = arith.constant 0 : index
    %c0_13 = arith.constant 0 : index
    %23 = vector.load %arg8[%c0_11, %c1, %c0_12, %c0_13] : memref<2x4x1x32xf32, #tpu.memory_space<vmem>>, vector<1x1x1x32xf32>
    %24 = vector.shape_cast %23 : vector<1x1x1x32xf32> to vector<1x32xf32>
    %cst_14 = arith.constant dense<0.000000e+00> : vector<16xf32>
    %25 = vector.multi_reduction <add>, %13, %cst_14 [1] : vector<16x32xf32> to vector<16xf32>
    %26 = vector.shape_cast %25 : vector<16xf32> to vector<16x1xf32>
    %cst_15 = arith.constant 3.200000e+01 : f32
    %27 = vector.broadcast %cst_15 : f32 to vector<16x1xf32>
    %28 = arith.divf %26, %27 : vector<16x1xf32>
    %29 = vector.broadcast %28 : vector<16x1xf32> to vector<16x32xf32>
    %30 = arith.subf %13, %29 : vector<16x32xf32>
    %31 = arith.mulf %30, %30 : vector<16x32xf32>
    %cst_16 = arith.constant dense<0.000000e+00> : vector<16xf32>
    %32 = vector.multi_reduction <add>, %31, %cst_16 [1] : vector<16x32xf32> to vector<16xf32>
    %33 = vector.shape_cast %32 : vector<16xf32> to vector<16x1xf32>
    %cst_17 = arith.constant 3.200000e+01 : f32
    %34 = vector.broadcast %cst_17 : f32 to vector<16x1xf32>
    %35 = arith.divf %33, %34 : vector<16x1xf32>
    %cst_18 = arith.constant 9.99999974E-6 : f32
    %36 = vector.broadcast %cst_18 : f32 to vector<16x1xf32>
    %37 = arith.addf %35, %36 : vector<16x1xf32>
    %38 = math.rsqrt %37 : vector<16x1xf32>
    %39 = vector.broadcast %38 : vector<16x1xf32> to vector<16x32xf32>
    %40 = arith.mulf %30, %39 : vector<16x32xf32>
    %41 = vector.broadcast %22 : vector<1x32xf32> to vector<16x32xf32>
    %42 = arith.mulf %40, %41 : vector<16x32xf32>
    %43 = vector.broadcast %24 : vector<1x32xf32> to vector<16x32xf32>
    %44 = arith.addf %42, %43 : vector<16x32xf32>
    %c0_19 = arith.constant 0 : index
    %c0_20 = arith.constant 0 : index
    %c0_21 = arith.constant 0 : index
    %45 = vector.load %arg4[%c0_19, %c0_20, %c0_21] : memref<2x32x96xf32, #tpu.memory_space<vmem>>, vector<1x32x96xf32>
    %46 = vector.shape_cast %45 : vector<1x32x96xf32> to vector<32x96xf32>
    %cst_22 = arith.constant dense<0.000000e+00> : vector<16x96xf32>
    %47 = tpu.matmul %44, %46, %cst_22 {dimension_numbers = #tpu.dot_dimension_numbers<[1], [0], [0], [1], [0, 0, 1, 1], [], []>} : vector<16x32xf32>, vector<32x96xf32>, vector<16x96xf32> -> vector<16x96xf32>
    %c0_23 = arith.constant 0 : index
    %c0_24 = arith.constant 0 : index
    %c0_25 = arith.constant 0 : index
    %48 = vector.load %arg5[%c0_23, %c0_24, %c0_25] : memref<2x1x96xf32, #tpu.memory_space<vmem>>, vector<1x1x96xf32>
    %49 = vector.shape_cast %48 : vector<1x1x96xf32> to vector<1x96xf32>
    %50 = vector.broadcast %49 : vector<1x96xf32> to vector<16x96xf32>
    %51 = arith.addf %47, %50 : vector<16x96xf32>
    %52 = vector.extract_strided_slice %51 {offsets = [0, 0], sizes = [16, 32], strides = [1, 1]} : vector<16x96xf32> to vector<16x32xf32>
    %53 = vector.shape_cast %52 : vector<16x32xf32> to vector<2x8x32xf32>
    %54 = vector.extract_strided_slice %51 {offsets = [0, 32], sizes = [16, 32], strides = [1, 1]} : vector<16x96xf32> to vector<16x32xf32>
    %55 = vector.shape_cast %54 : vector<16x32xf32> to vector<2x8x32xf32>
    %56 = vector.extract_strided_slice %51 {offsets = [0, 64], sizes = [16, 32], strides = [1, 1]} : vector<16x96xf32> to vector<16x32xf32>
    %57 = vector.shape_cast %56 : vector<16x32xf32> to vector<2x8x32xf32>
    %58 = vector.extract_strided_slice %53 {offsets = [0, 0, 0], sizes = [2, 8, 8], strides = [1, 1, 1]} : vector<2x8x32xf32> to vector<2x8x8xf32>
    %59 = vector.extract_strided_slice %55 {offsets = [0, 0, 0], sizes = [2, 8, 8], strides = [1, 1, 1]} : vector<2x8x32xf32> to vector<2x8x8xf32>
    "tpu.trace_start"() <{level = 10 : i32, message = "bqd,bkd->bqk"}> : () -> ()
    %cst_26 = arith.constant dense<0.000000e+00> : vector<2x8x8xf32>
    %60 = tpu.matmul %58, %59, %cst_26 {dimension_numbers = #tpu.dot_dimension_numbers<[2], [2], [1], [1], [0, 0, 0, 1, 1, 1], [0], [0]>} : vector<2x8x8xf32>, vector<2x8x8xf32>, vector<2x8x8xf32> -> vector<2x8x8xf32>
    "tpu.trace_stop"() : () -> ()
    %61 = vector.broadcast %20 : vector<1x8x8xf32> to vector<2x8x8xf32>
    %62 = arith.addf %60, %61 : vector<2x8x8xf32>
    %cst_27 = arith.constant dense<0xFF800000> : vector<2x8xf32>
    %63 = vector.multi_reduction <maximumf>, %62, %cst_27 [2] : vector<2x8x8xf32> to vector<2x8xf32>
    %64 = vector.shape_cast %63 : vector<2x8xf32> to vector<2x8x1xf32>
    %65 = vector.broadcast %64 : vector<2x8x1xf32> to vector<2x8x8xf32>
    %66 = arith.subf %62, %65 : vector<2x8x8xf32>
    %67 = math.exp %66 : vector<2x8x8xf32>
    %cst_28 = arith.constant dense<0.000000e+00> : vector<2x8xf32>
    %68 = vector.multi_reduction <add>, %67, %cst_28 [2] : vector<2x8x8xf32> to vector<2x8xf32>
    %69 = vector.shape_cast %68 : vector<2x8xf32> to vector<2x8x1xf32>
    %70 = tpu.reciprocal %69 {approx = true} : vector<2x8x1xf32> -> vector<2x8x1xf32>
    %71 = vector.broadcast %70 : vector<2x8x1xf32> to vector<2x8x8xf32>
    %72 = arith.mulf %67, %71 : vector<2x8x8xf32>
    %73 = vector.extract_strided_slice %57 {offsets = [0, 0, 0], sizes = [2, 8, 8], strides = [1, 1, 1]} : vector<2x8x32xf32> to vector<2x8x8xf32>
    "tpu.trace_start"() <{level = 10 : i32, message = "bqk,bkd->bqd"}> : () -> ()
    %cst_29 = arith.constant dense<0.000000e+00> : vector<2x8x8xf32>
    %74 = tpu.matmul %72, %73, %cst_29 {dimension_numbers = #tpu.dot_dimension_numbers<[2], [1], [1], [2], [0, 0, 0, 1, 1, 2], [0], [0]>} : vector<2x8x8xf32>, vector<2x8x8xf32>, vector<2x8x8xf32> -> vector<2x8x8xf32>
    "tpu.trace_stop"() : () -> ()
    %75 = vector.shape_cast %74 : vector<2x8x8xf32> to vector<16x8xf32>
    %76 = vector.extract_strided_slice %53 {offsets = [0, 0, 8], sizes = [2, 8, 8], strides = [1, 1, 1]} : vector<2x8x32xf32> to vector<2x8x8xf32>
    %77 = vector.extract_strided_slice %55 {offsets = [0, 0, 8], sizes = [2, 8, 8], strides = [1, 1, 1]} : vector<2x8x32xf32> to vector<2x8x8xf32>
    "tpu.trace_start"() <{level = 10 : i32, message = "bqd,bkd->bqk"}> : () -> ()
    %cst_30 = arith.constant dense<0.000000e+00> : vector<2x8x8xf32>
    %78 = tpu.matmul %76, %77, %cst_30 {dimension_numbers = #tpu.dot_dimension_numbers<[2], [2], [1], [1], [0, 0, 0, 1, 1, 1], [0], [0]>} : vector<2x8x8xf32>, vector<2x8x8xf32>, vector<2x8x8xf32> -> vector<2x8x8xf32>
    "tpu.trace_stop"() : () -> ()
    %79 = vector.broadcast %20 : vector<1x8x8xf32> to vector<2x8x8xf32>
    %80 = arith.addf %78, %79 : vector<2x8x8xf32>
    %cst_31 = arith.constant dense<0xFF800000> : vector<2x8xf32>
    %81 = vector.multi_reduction <maximumf>, %80, %cst_31 [2] : vector<2x8x8xf32> to vector<2x8xf32>
    %82 = vector.shape_cast %81 : vector<2x8xf32> to vector<2x8x1xf32>
    %83 = vector.broadcast %82 : vector<2x8x1xf32> to vector<2x8x8xf32>
    %84 = arith.subf %80, %83 : vector<2x8x8xf32>
    %85 = math.exp %84 : vector<2x8x8xf32>
    %cst_32 = arith.constant dense<0.000000e+00> : vector<2x8xf32>
    %86 = vector.multi_reduction <add>, %85, %cst_32 [2] : vector<2x8x8xf32> to vector<2x8xf32>
    %87 = vector.shape_cast %86 : vector<2x8xf32> to vector<2x8x1xf32>
    %88 = tpu.reciprocal %87 {approx = true} : vector<2x8x1xf32> -> vector<2x8x1xf32>
    %89 = vector.broadcast %88 : vector<2x8x1xf32> to vector<2x8x8xf32>
    %90 = arith.mulf %85, %89 : vector<2x8x8xf32>
    %91 = vector.extract_strided_slice %57 {offsets = [0, 0, 8], sizes = [2, 8, 8], strides = [1, 1, 1]} : vector<2x8x32xf32> to vector<2x8x8xf32>
    "tpu.trace_start"() <{level = 10 : i32, message = "bqk,bkd->bqd"}> : () -> ()
    %cst_33 = arith.constant dense<0.000000e+00> : vector<2x8x8xf32>
    %92 = tpu.matmul %90, %91, %cst_33 {dimension_numbers = #tpu.dot_dimension_numbers<[2], [1], [1], [2], [0, 0, 0, 1, 1, 2], [0], [0]>} : vector<2x8x8xf32>, vector<2x8x8xf32>, vector<2x8x8xf32> -> vector<2x8x8xf32>
    "tpu.trace_stop"() : () -> ()
    %93 = vector.shape_cast %92 : vector<2x8x8xf32> to vector<16x8xf32>
    %94 = vector.extract_strided_slice %53 {offsets = [0, 0, 16], sizes = [2, 8, 8], strides = [1, 1, 1]} : vector<2x8x32xf32> to vector<2x8x8xf32>
    %95 = vector.extract_strided_slice %55 {offsets = [0, 0, 16], sizes = [2, 8, 8], strides = [1, 1, 1]} : vector<2x8x32xf32> to vector<2x8x8xf32>
    "tpu.trace_start"() <{level = 10 : i32, message = "bqd,bkd->bqk"}> : () -> ()
    %cst_34 = arith.constant dense<0.000000e+00> : vector<2x8x8xf32>
    %96 = tpu.matmul %94, %95, %cst_34 {dimension_numbers = #tpu.dot_dimension_numbers<[2], [2], [1], [1], [0, 0, 0, 1, 1, 1], [0], [0]>} : vector<2x8x8xf32>, vector<2x8x8xf32>, vector<2x8x8xf32> -> vector<2x8x8xf32>
    "tpu.trace_stop"() : () -> ()
    %97 = vector.broadcast %20 : vector<1x8x8xf32> to vector<2x8x8xf32>
    %98 = arith.addf %96, %97 : vector<2x8x8xf32>
    %cst_35 = arith.constant dense<0xFF800000> : vector<2x8xf32>
    %99 = vector.multi_reduction <maximumf>, %98, %cst_35 [2] : vector<2x8x8xf32> to vector<2x8xf32>
    %100 = vector.shape_cast %99 : vector<2x8xf32> to vector<2x8x1xf32>
    %101 = vector.broadcast %100 : vector<2x8x1xf32> to vector<2x8x8xf32>
    %102 = arith.subf %98, %101 : vector<2x8x8xf32>
    %103 = math.exp %102 : vector<2x8x8xf32>
    %cst_36 = arith.constant dense<0.000000e+00> : vector<2x8xf32>
    %104 = vector.multi_reduction <add>, %103, %cst_36 [2] : vector<2x8x8xf32> to vector<2x8xf32>
    %105 = vector.shape_cast %104 : vector<2x8xf32> to vector<2x8x1xf32>
    %106 = tpu.reciprocal %105 {approx = true} : vector<2x8x1xf32> -> vector<2x8x1xf32>
    %107 = vector.broadcast %106 : vector<2x8x1xf32> to vector<2x8x8xf32>
    %108 = arith.mulf %103, %107 : vector<2x8x8xf32>
    %109 = vector.extract_strided_slice %57 {offsets = [0, 0, 16], sizes = [2, 8, 8], strides = [1, 1, 1]} : vector<2x8x32xf32> to vector<2x8x8xf32>
    "tpu.trace_start"() <{level = 10 : i32, message = "bqk,bkd->bqd"}> : () -> ()
    %cst_37 = arith.constant dense<0.000000e+00> : vector<2x8x8xf32>
    %110 = tpu.matmul %108, %109, %cst_37 {dimension_numbers = #tpu.dot_dimension_numbers<[2], [1], [1], [2], [0, 0, 0, 1, 1, 2], [0], [0]>} : vector<2x8x8xf32>, vector<2x8x8xf32>, vector<2x8x8xf32> -> vector<2x8x8xf32>
    "tpu.trace_stop"() : () -> ()
    %111 = vector.shape_cast %110 : vector<2x8x8xf32> to vector<16x8xf32>
    %112 = vector.extract_strided_slice %53 {offsets = [0, 0, 24], sizes = [2, 8, 8], strides = [1, 1, 1]} : vector<2x8x32xf32> to vector<2x8x8xf32>
    %113 = vector.extract_strided_slice %55 {offsets = [0, 0, 24], sizes = [2, 8, 8], strides = [1, 1, 1]} : vector<2x8x32xf32> to vector<2x8x8xf32>
    "tpu.trace_start"() <{level = 10 : i32, message = "bqd,bkd->bqk"}> : () -> ()
    %cst_38 = arith.constant dense<0.000000e+00> : vector<2x8x8xf32>
    %114 = tpu.matmul %112, %113, %cst_38 {dimension_numbers = #tpu.dot_dimension_numbers<[2], [2], [1], [1], [0, 0, 0, 1, 1, 1], [0], [0]>} : vector<2x8x8xf32>, vector<2x8x8xf32>, vector<2x8x8xf32> -> vector<2x8x8xf32>
    "tpu.trace_stop"() : () -> ()
    %115 = vector.broadcast %20 : vector<1x8x8xf32> to vector<2x8x8xf32>
    %116 = arith.addf %114, %115 : vector<2x8x8xf32>
    %cst_39 = arith.constant dense<0xFF800000> : vector<2x8xf32>
    %117 = vector.multi_reduction <maximumf>, %116, %cst_39 [2] : vector<2x8x8xf32> to vector<2x8xf32>
    %118 = vector.shape_cast %117 : vector<2x8xf32> to vector<2x8x1xf32>
    %119 = vector.broadcast %118 : vector<2x8x1xf32> to vector<2x8x8xf32>
    %120 = arith.subf %116, %119 : vector<2x8x8xf32>
    %121 = math.exp %120 : vector<2x8x8xf32>
    %cst_40 = arith.constant dense<0.000000e+00> : vector<2x8xf32>
    %122 = vector.multi_reduction <add>, %121, %cst_40 [2] : vector<2x8x8xf32> to vector<2x8xf32>
    %123 = vector.shape_cast %122 : vector<2x8xf32> to vector<2x8x1xf32>
    %124 = tpu.reciprocal %123 {approx = true} : vector<2x8x1xf32> -> vector<2x8x1xf32>
    %125 = vector.broadcast %124 : vector<2x8x1xf32> to vector<2x8x8xf32>
    %126 = arith.mulf %121, %125 : vector<2x8x8xf32>
    %127 = vector.extract_strided_slice %57 {offsets = [0, 0, 24], sizes = [2, 8, 8], strides = [1, 1, 1]} : vector<2x8x32xf32> to vector<2x8x8xf32>
    "tpu.trace_start"() <{level = 10 : i32, message = "bqk,bkd->bqd"}> : () -> ()
    %cst_41 = arith.constant dense<0.000000e+00> : vector<2x8x8xf32>
    %128 = tpu.matmul %126, %127, %cst_41 {dimension_numbers = #tpu.dot_dimension_numbers<[2], [1], [1], [2], [0, 0, 0, 1, 1, 2], [0], [0]>} : vector<2x8x8xf32>, vector<2x8x8xf32>, vector<2x8x8xf32> -> vector<2x8x8xf32>
    "tpu.trace_stop"() : () -> ()
    %129 = vector.shape_cast %128 : vector<2x8x8xf32> to vector<16x8xf32>
    %130 = tpu.concatenate %75, %93, %111, %129 in 1 : vector<16x8xf32>, vector<16x8xf32>, vector<16x8xf32>, vector<16x8xf32> -> vector<16x32xf32>
    %c0_42 = arith.constant 0 : index
    %c0_43 = arith.constant 0 : index
    %c0_44 = arith.constant 0 : index
    %131 = vector.load %arg6[%c0_42, %c0_43, %c0_44] : memref<2x32x32xf32, #tpu.memory_space<vmem>>, vector<1x32x32xf32>
    %132 = vector.shape_cast %131 : vector<1x32x32xf32> to vector<32x32xf32>
    %cst_45 = arith.constant dense<0.000000e+00> : vector<16x32xf32>
    %133 = tpu.matmul %130, %132, %cst_45 {dimension_numbers = #tpu.dot_dimension_numbers<[1], [0], [0], [1], [0, 0, 1, 1], [], []>} : vector<16x32xf32>, vector<32x32xf32>, vector<16x32xf32> -> vector<16x32xf32>
    %134 = arith.addf %13, %133 : vector<16x32xf32>
    %c0_46 = arith.constant 0 : index
    %c0_47 = arith.constant 0 : index
    %c0_48 = arith.constant 0 : index
    %135 = vector.load %arg7[%c0_46, %c0_47, %c0_48] : memref<2x1x32xf32, #tpu.memory_space<vmem>>, vector<1x1x32xf32>
    %136 = vector.shape_cast %135 : vector<1x1x32xf32> to vector<1x32xf32>
    %137 = vector.broadcast %136 : vector<1x32xf32> to vector<16x32xf32>
    %138 = arith.addf %134, %137 : vector<16x32xf32>
    %c0_49 = arith.constant 0 : index
    %c2 = arith.constant 2 : index
    %c0_50 = arith.constant 0 : index
    %c0_51 = arith.constant 0 : index
    %139 = vector.load %arg8[%c0_49, %c2, %c0_50, %c0_51] : memref<2x4x1x32xf32, #tpu.memory_space<vmem>>, vector<1x1x1x32xf32>
    %140 = vector.shape_cast %139 : vector<1x1x1x32xf32> to vector<1x32xf32>
    %c0_52 = arith.constant 0 : index
    %c3 = arith.constant 3 : index
    %c0_53 = arith.constant 0 : index
    %c0_54 = arith.constant 0 : index
    %141 = vector.load %arg8[%c0_52, %c3, %c0_53, %c0_54] : memref<2x4x1x32xf32, #tpu.memory_space<vmem>>, vector<1x1x1x32xf32>
    %142 = vector.shape_cast %141 : vector<1x1x1x32xf32> to vector<1x32xf32>
    %cst_55 = arith.constant dense<0.000000e+00> : vector<16xf32>
    %143 = vector.multi_reduction <add>, %138, %cst_55 [1] : vector<16x32xf32> to vector<16xf32>
    %144 = vector.shape_cast %143 : vector<16xf32> to vector<16x1xf32>
    %cst_56 = arith.constant 3.200000e+01 : f32
    %145 = vector.broadcast %cst_56 : f32 to vector<16x1xf32>
    %146 = arith.divf %144, %145 : vector<16x1xf32>
    %147 = vector.broadcast %146 : vector<16x1xf32> to vector<16x32xf32>
    %148 = arith.subf %138, %147 : vector<16x32xf32>
    %149 = arith.mulf %148, %148 : vector<16x32xf32>
    %cst_57 = arith.constant dense<0.000000e+00> : vector<16xf32>
    %150 = vector.multi_reduction <add>, %149, %cst_57 [1] : vector<16x32xf32> to vector<16xf32>
    %151 = vector.shape_cast %150 : vector<16xf32> to vector<16x1xf32>
    %cst_58 = arith.constant 3.200000e+01 : f32
    %152 = vector.broadcast %cst_58 : f32 to vector<16x1xf32>
    %153 = arith.divf %151, %152 : vector<16x1xf32>
    %cst_59 = arith.constant 9.99999974E-6 : f32
    %154 = vector.broadcast %cst_59 : f32 to vector<16x1xf32>
    %155 = arith.addf %153, %154 : vector<16x1xf32>
    %156 = math.rsqrt %155 : vector<16x1xf32>
    %157 = vector.broadcast %156 : vector<16x1xf32> to vector<16x32xf32>
    %158 = arith.mulf %148, %157 : vector<16x32xf32>
    %159 = vector.broadcast %140 : vector<1x32xf32> to vector<16x32xf32>
    %160 = arith.mulf %158, %159 : vector<16x32xf32>
    %161 = vector.broadcast %142 : vector<1x32xf32> to vector<16x32xf32>
    %162 = arith.addf %160, %161 : vector<16x32xf32>
    %c0_60 = arith.constant 0 : index
    %c0_61 = arith.constant 0 : index
    %c0_62 = arith.constant 0 : index
    %163 = vector.load %arg9[%c0_60, %c0_61, %c0_62] : memref<2x32x128xf32, #tpu.memory_space<vmem>>, vector<1x32x128xf32>
    %164 = vector.shape_cast %163 : vector<1x32x128xf32> to vector<32x128xf32>
    %cst_63 = arith.constant dense<0.000000e+00> : vector<16x128xf32>
    %165 = tpu.matmul %162, %164, %cst_63 {dimension_numbers = #tpu.dot_dimension_numbers<[1], [0], [0], [1], [0, 0, 1, 1], [], []>} : vector<16x32xf32>, vector<32x128xf32>, vector<16x128xf32> -> vector<16x128xf32>
    %c0_64 = arith.constant 0 : index
    %c0_65 = arith.constant 0 : index
    %c0_66 = arith.constant 0 : index
    %166 = vector.load %arg10[%c0_64, %c0_65, %c0_66] : memref<2x1x128xf32, #tpu.memory_space<vmem>>, vector<1x1x128xf32>
    %167 = vector.shape_cast %166 : vector<1x1x128xf32> to vector<1x128xf32>
    %168 = vector.broadcast %167 : vector<1x128xf32> to vector<16x128xf32>
    %169 = arith.addf %165, %168 : vector<16x128xf32>
    %cst_67 = arith.constant 5.000000e-01 : f32
    %170 = vector.broadcast %cst_67 : f32 to vector<16x128xf32>
    %171 = arith.mulf %170, %169 : vector<16x128xf32>
    %cst_68 = arith.constant 4.471500e-02 : f32
    %172 = vector.broadcast %cst_68 : f32 to vector<16x128xf32>
    %173 = arith.mulf %172, %169 : vector<16x128xf32>
    %174 = arith.mulf %173, %169 : vector<16x128xf32>
    %175 = arith.mulf %174, %169 : vector<16x128xf32>
    %176 = arith.addf %169, %175 : vector<16x128xf32>
    %cst_69 = arith.constant 0.797884583 : f32
    %177 = vector.broadcast %cst_69 : f32 to vector<16x128xf32>
    %178 = arith.mulf %177, %176 : vector<16x128xf32>
    %179 = math.tanh %178 : vector<16x128xf32>
    %cst_70 = arith.constant 1.000000e+00 : f32
    %180 = vector.broadcast %cst_70 : f32 to vector<16x128xf32>
    %181 = arith.addf %180, %179 : vector<16x128xf32>
    %182 = arith.mulf %171, %181 : vector<16x128xf32>
    %c0_71 = arith.constant 0 : index
    %c0_72 = arith.constant 0 : index
    %c0_73 = arith.constant 0 : index
    %183 = vector.load %arg11[%c0_71, %c0_72, %c0_73] : memref<2x128x32xf32, #tpu.memory_space<vmem>>, vector<1x128x32xf32>
    %184 = vector.shape_cast %183 : vector<1x128x32xf32> to vector<128x32xf32>
    %cst_74 = arith.constant dense<0.000000e+00> : vector<16x32xf32>
    %185 = tpu.matmul %182, %184, %cst_74 {dimension_numbers = #tpu.dot_dimension_numbers<[1], [0], [0], [1], [0, 0, 1, 1], [], []>} : vector<16x128xf32>, vector<128x32xf32>, vector<16x32xf32> -> vector<16x32xf32>
    %186 = arith.addf %138, %185 : vector<16x32xf32>
    %c0_75 = arith.constant 0 : index
    %c0_76 = arith.constant 0 : index
    %c0_77 = arith.constant 0 : index
    %187 = vector.load %arg12[%c0_75, %c0_76, %c0_77] : memref<2x1x32xf32, #tpu.memory_space<vmem>>, vector<1x1x32xf32>
    %188 = vector.shape_cast %187 : vector<1x1x32xf32> to vector<1x32xf32>
    %189 = vector.broadcast %188 : vector<1x32xf32> to vector<16x32xf32>
    %190 = arith.addf %186, %189 : vector<16x32xf32>
    %c1_78 = arith.constant 1 : index
    %c0_79 = arith.constant 0 : index
    %c0_80 = arith.constant 0 : index
    %c0_81 = arith.constant 0 : index
    %191 = vector.load %arg8[%c1_78, %c0_79, %c0_80, %c0_81] : memref<2x4x1x32xf32, #tpu.memory_space<vmem>>, vector<1x1x1x32xf32>
    %192 = vector.shape_cast %191 : vector<1x1x1x32xf32> to vector<1x32xf32>
    %c1_82 = arith.constant 1 : index
    %c1_83 = arith.constant 1 : index
    %c0_84 = arith.constant 0 : index
    %c0_85 = arith.constant 0 : index
    %193 = vector.load %arg8[%c1_82, %c1_83, %c0_84, %c0_85] : memref<2x4x1x32xf32, #tpu.memory_space<vmem>>, vector<1x1x1x32xf32>
    %194 = vector.shape_cast %193 : vector<1x1x1x32xf32> to vector<1x32xf32>
    %cst_86 = arith.constant dense<0.000000e+00> : vector<16xf32>
    %195 = vector.multi_reduction <add>, %190, %cst_86 [1] : vector<16x32xf32> to vector<16xf32>
    %196 = vector.shape_cast %195 : vector<16xf32> to vector<16x1xf32>
    %cst_87 = arith.constant 3.200000e+01 : f32
    %197 = vector.broadcast %cst_87 : f32 to vector<16x1xf32>
    %198 = arith.divf %196, %197 : vector<16x1xf32>
    %199 = vector.broadcast %198 : vector<16x1xf32> to vector<16x32xf32>
    %200 = arith.subf %190, %199 : vector<16x32xf32>
    %201 = arith.mulf %200, %200 : vector<16x32xf32>
    %cst_88 = arith.constant dense<0.000000e+00> : vector<16xf32>
    %202 = vector.multi_reduction <add>, %201, %cst_88 [1] : vector<16x32xf32> to vector<16xf32>
    %203 = vector.shape_cast %202 : vector<16xf32> to vector<16x1xf32>
    %cst_89 = arith.constant 3.200000e+01 : f32
    %204 = vector.broadcast %cst_89 : f32 to vector<16x1xf32>
    %205 = arith.divf %203, %204 : vector<16x1xf32>
    %cst_90 = arith.constant 9.99999974E-6 : f32
    %206 = vector.broadcast %cst_90 : f32 to vector<16x1xf32>
    %207 = arith.addf %205, %206 : vector<16x1xf32>
    %208 = math.rsqrt %207 : vector<16x1xf32>
    %209 = vector.broadcast %208 : vector<16x1xf32> to vector<16x32xf32>
    %210 = arith.mulf %200, %209 : vector<16x32xf32>
    %211 = vector.broadcast %192 : vector<1x32xf32> to vector<16x32xf32>
    %212 = arith.mulf %210, %211 : vector<16x32xf32>
    %213 = vector.broadcast %194 : vector<1x32xf32> to vector<16x32xf32>
    %214 = arith.addf %212, %213 : vector<16x32xf32>
    %c1_91 = arith.constant 1 : index
    %c0_92 = arith.constant 0 : index
    %c0_93 = arith.constant 0 : index
    %215 = vector.load %arg4[%c1_91, %c0_92, %c0_93] : memref<2x32x96xf32, #tpu.memory_space<vmem>>, vector<1x32x96xf32>
    %216 = vector.shape_cast %215 : vector<1x32x96xf32> to vector<32x96xf32>
    %cst_94 = arith.constant dense<0.000000e+00> : vector<16x96xf32>
    %217 = tpu.matmul %214, %216, %cst_94 {dimension_numbers = #tpu.dot_dimension_numbers<[1], [0], [0], [1], [0, 0, 1, 1], [], []>} : vector<16x32xf32>, vector<32x96xf32>, vector<16x96xf32> -> vector<16x96xf32>
    %c1_95 = arith.constant 1 : index
    %c0_96 = arith.constant 0 : index
    %c0_97 = arith.constant 0 : index
    %218 = vector.load %arg5[%c1_95, %c0_96, %c0_97] : memref<2x1x96xf32, #tpu.memory_space<vmem>>, vector<1x1x96xf32>
    %219 = vector.shape_cast %218 : vector<1x1x96xf32> to vector<1x96xf32>
    %220 = vector.broadcast %219 : vector<1x96xf32> to vector<16x96xf32>
    %221 = arith.addf %217, %220 : vector<16x96xf32>
    %222 = vector.extract_strided_slice %221 {offsets = [0, 0], sizes = [16, 32], strides = [1, 1]} : vector<16x96xf32> to vector<16x32xf32>
    %223 = vector.shape_cast %222 : vector<16x32xf32> to vector<2x8x32xf32>
    %224 = vector.extract_strided_slice %221 {offsets = [0, 32], sizes = [16, 32], strides = [1, 1]} : vector<16x96xf32> to vector<16x32xf32>
    %225 = vector.shape_cast %224 : vector<16x32xf32> to vector<2x8x32xf32>
    %226 = vector.extract_strided_slice %221 {offsets = [0, 64], sizes = [16, 32], strides = [1, 1]} : vector<16x96xf32> to vector<16x32xf32>
    %227 = vector.shape_cast %226 : vector<16x32xf32> to vector<2x8x32xf32>
    %228 = vector.extract_strided_slice %223 {offsets = [0, 0, 0], sizes = [2, 8, 8], strides = [1, 1, 1]} : vector<2x8x32xf32> to vector<2x8x8xf32>
    %229 = vector.extract_strided_slice %225 {offsets = [0, 0, 0], sizes = [2, 8, 8], strides = [1, 1, 1]} : vector<2x8x32xf32> to vector<2x8x8xf32>
    "tpu.trace_start"() <{level = 10 : i32, message = "bqd,bkd->bqk"}> : () -> ()
    %cst_98 = arith.constant dense<0.000000e+00> : vector<2x8x8xf32>
    %230 = tpu.matmul %228, %229, %cst_98 {dimension_numbers = #tpu.dot_dimension_numbers<[2], [2], [1], [1], [0, 0, 0, 1, 1, 1], [0], [0]>} : vector<2x8x8xf32>, vector<2x8x8xf32>, vector<2x8x8xf32> -> vector<2x8x8xf32>
    "tpu.trace_stop"() : () -> ()
    %231 = vector.broadcast %20 : vector<1x8x8xf32> to vector<2x8x8xf32>
    %232 = arith.addf %230, %231 : vector<2x8x8xf32>
    %cst_99 = arith.constant dense<0xFF800000> : vector<2x8xf32>
    %233 = vector.multi_reduction <maximumf>, %232, %cst_99 [2] : vector<2x8x8xf32> to vector<2x8xf32>
    %234 = vector.shape_cast %233 : vector<2x8xf32> to vector<2x8x1xf32>
    %235 = vector.broadcast %234 : vector<2x8x1xf32> to vector<2x8x8xf32>
    %236 = arith.subf %232, %235 : vector<2x8x8xf32>
    %237 = math.exp %236 : vector<2x8x8xf32>
    %cst_100 = arith.constant dense<0.000000e+00> : vector<2x8xf32>
    %238 = vector.multi_reduction <add>, %237, %cst_100 [2] : vector<2x8x8xf32> to vector<2x8xf32>
    %239 = vector.shape_cast %238 : vector<2x8xf32> to vector<2x8x1xf32>
    %240 = tpu.reciprocal %239 {approx = true} : vector<2x8x1xf32> -> vector<2x8x1xf32>
    %241 = vector.broadcast %240 : vector<2x8x1xf32> to vector<2x8x8xf32>
    %242 = arith.mulf %237, %241 : vector<2x8x8xf32>
    %243 = vector.extract_strided_slice %227 {offsets = [0, 0, 0], sizes = [2, 8, 8], strides = [1, 1, 1]} : vector<2x8x32xf32> to vector<2x8x8xf32>
    "tpu.trace_start"() <{level = 10 : i32, message = "bqk,bkd->bqd"}> : () -> ()
    %cst_101 = arith.constant dense<0.000000e+00> : vector<2x8x8xf32>
    %244 = tpu.matmul %242, %243, %cst_101 {dimension_numbers = #tpu.dot_dimension_numbers<[2], [1], [1], [2], [0, 0, 0, 1, 1, 2], [0], [0]>} : vector<2x8x8xf32>, vector<2x8x8xf32>, vector<2x8x8xf32> -> vector<2x8x8xf32>
    "tpu.trace_stop"() : () -> ()
    %245 = vector.shape_cast %244 : vector<2x8x8xf32> to vector<16x8xf32>
    %246 = vector.extract_strided_slice %223 {offsets = [0, 0, 8], sizes = [2, 8, 8], strides = [1, 1, 1]} : vector<2x8x32xf32> to vector<2x8x8xf32>
    %247 = vector.extract_strided_slice %225 {offsets = [0, 0, 8], sizes = [2, 8, 8], strides = [1, 1, 1]} : vector<2x8x32xf32> to vector<2x8x8xf32>
    "tpu.trace_start"() <{level = 10 : i32, message = "bqd,bkd->bqk"}> : () -> ()
    %cst_102 = arith.constant dense<0.000000e+00> : vector<2x8x8xf32>
    %248 = tpu.matmul %246, %247, %cst_102 {dimension_numbers = #tpu.dot_dimension_numbers<[2], [2], [1], [1], [0, 0, 0, 1, 1, 1], [0], [0]>} : vector<2x8x8xf32>, vector<2x8x8xf32>, vector<2x8x8xf32> -> vector<2x8x8xf32>
    "tpu.trace_stop"() : () -> ()
    %249 = vector.broadcast %20 : vector<1x8x8xf32> to vector<2x8x8xf32>
    %250 = arith.addf %248, %249 : vector<2x8x8xf32>
    %cst_103 = arith.constant dense<0xFF800000> : vector<2x8xf32>
    %251 = vector.multi_reduction <maximumf>, %250, %cst_103 [2] : vector<2x8x8xf32> to vector<2x8xf32>
    %252 = vector.shape_cast %251 : vector<2x8xf32> to vector<2x8x1xf32>
    %253 = vector.broadcast %252 : vector<2x8x1xf32> to vector<2x8x8xf32>
    %254 = arith.subf %250, %253 : vector<2x8x8xf32>
    %255 = math.exp %254 : vector<2x8x8xf32>
    %cst_104 = arith.constant dense<0.000000e+00> : vector<2x8xf32>
    %256 = vector.multi_reduction <add>, %255, %cst_104 [2] : vector<2x8x8xf32> to vector<2x8xf32>
    %257 = vector.shape_cast %256 : vector<2x8xf32> to vector<2x8x1xf32>
    %258 = tpu.reciprocal %257 {approx = true} : vector<2x8x1xf32> -> vector<2x8x1xf32>
    %259 = vector.broadcast %258 : vector<2x8x1xf32> to vector<2x8x8xf32>
    %260 = arith.mulf %255, %259 : vector<2x8x8xf32>
    %261 = vector.extract_strided_slice %227 {offsets = [0, 0, 8], sizes = [2, 8, 8], strides = [1, 1, 1]} : vector<2x8x32xf32> to vector<2x8x8xf32>
    "tpu.trace_start"() <{level = 10 : i32, message = "bqk,bkd->bqd"}> : () -> ()
    %cst_105 = arith.constant dense<0.000000e+00> : vector<2x8x8xf32>
    %262 = tpu.matmul %260, %261, %cst_105 {dimension_numbers = #tpu.dot_dimension_numbers<[2], [1], [1], [2], [0, 0, 0, 1, 1, 2], [0], [0]>} : vector<2x8x8xf32>, vector<2x8x8xf32>, vector<2x8x8xf32> -> vector<2x8x8xf32>
    "tpu.trace_stop"() : () -> ()
    %263 = vector.shape_cast %262 : vector<2x8x8xf32> to vector<16x8xf32>
    %264 = vector.extract_strided_slice %223 {offsets = [0, 0, 16], sizes = [2, 8, 8], strides = [1, 1, 1]} : vector<2x8x32xf32> to vector<2x8x8xf32>
    %265 = vector.extract_strided_slice %225 {offsets = [0, 0, 16], sizes = [2, 8, 8], strides = [1, 1, 1]} : vector<2x8x32xf32> to vector<2x8x8xf32>
    "tpu.trace_start"() <{level = 10 : i32, message = "bqd,bkd->bqk"}> : () -> ()
    %cst_106 = arith.constant dense<0.000000e+00> : vector<2x8x8xf32>
    %266 = tpu.matmul %264, %265, %cst_106 {dimension_numbers = #tpu.dot_dimension_numbers<[2], [2], [1], [1], [0, 0, 0, 1, 1, 1], [0], [0]>} : vector<2x8x8xf32>, vector<2x8x8xf32>, vector<2x8x8xf32> -> vector<2x8x8xf32>
    "tpu.trace_stop"() : () -> ()
    %267 = vector.broadcast %20 : vector<1x8x8xf32> to vector<2x8x8xf32>
    %268 = arith.addf %266, %267 : vector<2x8x8xf32>
    %cst_107 = arith.constant dense<0xFF800000> : vector<2x8xf32>
    %269 = vector.multi_reduction <maximumf>, %268, %cst_107 [2] : vector<2x8x8xf32> to vector<2x8xf32>
    %270 = vector.shape_cast %269 : vector<2x8xf32> to vector<2x8x1xf32>
    %271 = vector.broadcast %270 : vector<2x8x1xf32> to vector<2x8x8xf32>
    %272 = arith.subf %268, %271 : vector<2x8x8xf32>
    %273 = math.exp %272 : vector<2x8x8xf32>
    %cst_108 = arith.constant dense<0.000000e+00> : vector<2x8xf32>
    %274 = vector.multi_reduction <add>, %273, %cst_108 [2] : vector<2x8x8xf32> to vector<2x8xf32>
    %275 = vector.shape_cast %274 : vector<2x8xf32> to vector<2x8x1xf32>
    %276 = tpu.reciprocal %275 {approx = true} : vector<2x8x1xf32> -> vector<2x8x1xf32>
    %277 = vector.broadcast %276 : vector<2x8x1xf32> to vector<2x8x8xf32>
    %278 = arith.mulf %273, %277 : vector<2x8x8xf32>
    %279 = vector.extract_strided_slice %227 {offsets = [0, 0, 16], sizes = [2, 8, 8], strides = [1, 1, 1]} : vector<2x8x32xf32> to vector<2x8x8xf32>
    "tpu.trace_start"() <{level = 10 : i32, message = "bqk,bkd->bqd"}> : () -> ()
    %cst_109 = arith.constant dense<0.000000e+00> : vector<2x8x8xf32>
    %280 = tpu.matmul %278, %279, %cst_109 {dimension_numbers = #tpu.dot_dimension_numbers<[2], [1], [1], [2], [0, 0, 0, 1, 1, 2], [0], [0]>} : vector<2x8x8xf32>, vector<2x8x8xf32>, vector<2x8x8xf32> -> vector<2x8x8xf32>
    "tpu.trace_stop"() : () -> ()
    %281 = vector.shape_cast %280 : vector<2x8x8xf32> to vector<16x8xf32>
    %282 = vector.extract_strided_slice %223 {offsets = [0, 0, 24], sizes = [2, 8, 8], strides = [1, 1, 1]} : vector<2x8x32xf32> to vector<2x8x8xf32>
    %283 = vector.extract_strided_slice %225 {offsets = [0, 0, 24], sizes = [2, 8, 8], strides = [1, 1, 1]} : vector<2x8x32xf32> to vector<2x8x8xf32>
    "tpu.trace_start"() <{level = 10 : i32, message = "bqd,bkd->bqk"}> : () -> ()
    %cst_110 = arith.constant dense<0.000000e+00> : vector<2x8x8xf32>
    %284 = tpu.matmul %282, %283, %cst_110 {dimension_numbers = #tpu.dot_dimension_numbers<[2], [2], [1], [1], [0, 0, 0, 1, 1, 1], [0], [0]>} : vector<2x8x8xf32>, vector<2x8x8xf32>, vector<2x8x8xf32> -> vector<2x8x8xf32>
    "tpu.trace_stop"() : () -> ()
    %285 = vector.broadcast %20 : vector<1x8x8xf32> to vector<2x8x8xf32>
    %286 = arith.addf %284, %285 : vector<2x8x8xf32>
    %cst_111 = arith.constant dense<0xFF800000> : vector<2x8xf32>
    %287 = vector.multi_reduction <maximumf>, %286, %cst_111 [2] : vector<2x8x8xf32> to vector<2x8xf32>
    %288 = vector.shape_cast %287 : vector<2x8xf32> to vector<2x8x1xf32>
    %289 = vector.broadcast %288 : vector<2x8x1xf32> to vector<2x8x8xf32>
    %290 = arith.subf %286, %289 : vector<2x8x8xf32>
    %291 = math.exp %290 : vector<2x8x8xf32>
    %cst_112 = arith.constant dense<0.000000e+00> : vector<2x8xf32>
    %292 = vector.multi_reduction <add>, %291, %cst_112 [2] : vector<2x8x8xf32> to vector<2x8xf32>
    %293 = vector.shape_cast %292 : vector<2x8xf32> to vector<2x8x1xf32>
    %294 = tpu.reciprocal %293 {approx = true} : vector<2x8x1xf32> -> vector<2x8x1xf32>
    %295 = vector.broadcast %294 : vector<2x8x1xf32> to vector<2x8x8xf32>
    %296 = arith.mulf %291, %295 : vector<2x8x8xf32>
    %297 = vector.extract_strided_slice %227 {offsets = [0, 0, 24], sizes = [2, 8, 8], strides = [1, 1, 1]} : vector<2x8x32xf32> to vector<2x8x8xf32>
    "tpu.trace_start"() <{level = 10 : i32, message = "bqk,bkd->bqd"}> : () -> ()
    %cst_113 = arith.constant dense<0.000000e+00> : vector<2x8x8xf32>
    %298 = tpu.matmul %296, %297, %cst_113 {dimension_numbers = #tpu.dot_dimension_numbers<[2], [1], [1], [2], [0, 0, 0, 1, 1, 2], [0], [0]>} : vector<2x8x8xf32>, vector<2x8x8xf32>, vector<2x8x8xf32> -> vector<2x8x8xf32>
    "tpu.trace_stop"() : () -> ()
    %299 = vector.shape_cast %298 : vector<2x8x8xf32> to vector<16x8xf32>
    %300 = tpu.concatenate %245, %263, %281, %299 in 1 : vector<16x8xf32>, vector<16x8xf32>, vector<16x8xf32>, vector<16x8xf32> -> vector<16x32xf32>
    %c1_114 = arith.constant 1 : index
    %c0_115 = arith.constant 0 : index
    %c0_116 = arith.constant 0 : index
    %301 = vector.load %arg6[%c1_114, %c0_115, %c0_116] : memref<2x32x32xf32, #tpu.memory_space<vmem>>, vector<1x32x32xf32>
    %302 = vector.shape_cast %301 : vector<1x32x32xf32> to vector<32x32xf32>
    %cst_117 = arith.constant dense<0.000000e+00> : vector<16x32xf32>
    %303 = tpu.matmul %300, %302, %cst_117 {dimension_numbers = #tpu.dot_dimension_numbers<[1], [0], [0], [1], [0, 0, 1, 1], [], []>} : vector<16x32xf32>, vector<32x32xf32>, vector<16x32xf32> -> vector<16x32xf32>
    %304 = arith.addf %190, %303 : vector<16x32xf32>
    %c1_118 = arith.constant 1 : index
    %c0_119 = arith.constant 0 : index
    %c0_120 = arith.constant 0 : index
    %305 = vector.load %arg7[%c1_118, %c0_119, %c0_120] : memref<2x1x32xf32, #tpu.memory_space<vmem>>, vector<1x1x32xf32>
    %306 = vector.shape_cast %305 : vector<1x1x32xf32> to vector<1x32xf32>
    %307 = vector.broadcast %306 : vector<1x32xf32> to vector<16x32xf32>
    %308 = arith.addf %304, %307 : vector<16x32xf32>
    %c1_121 = arith.constant 1 : index
    %c2_122 = arith.constant 2 : index
    %c0_123 = arith.constant 0 : index
    %c0_124 = arith.constant 0 : index
    %309 = vector.load %arg8[%c1_121, %c2_122, %c0_123, %c0_124] : memref<2x4x1x32xf32, #tpu.memory_space<vmem>>, vector<1x1x1x32xf32>
    %310 = vector.shape_cast %309 : vector<1x1x1x32xf32> to vector<1x32xf32>
    %c1_125 = arith.constant 1 : index
    %c3_126 = arith.constant 3 : index
    %c0_127 = arith.constant 0 : index
    %c0_128 = arith.constant 0 : index
    %311 = vector.load %arg8[%c1_125, %c3_126, %c0_127, %c0_128] : memref<2x4x1x32xf32, #tpu.memory_space<vmem>>, vector<1x1x1x32xf32>
    %312 = vector.shape_cast %311 : vector<1x1x1x32xf32> to vector<1x32xf32>
    %cst_129 = arith.constant dense<0.000000e+00> : vector<16xf32>
    %313 = vector.multi_reduction <add>, %308, %cst_129 [1] : vector<16x32xf32> to vector<16xf32>
    %314 = vector.shape_cast %313 : vector<16xf32> to vector<16x1xf32>
    %cst_130 = arith.constant 3.200000e+01 : f32
    %315 = vector.broadcast %cst_130 : f32 to vector<16x1xf32>
    %316 = arith.divf %314, %315 : vector<16x1xf32>
    %317 = vector.broadcast %316 : vector<16x1xf32> to vector<16x32xf32>
    %318 = arith.subf %308, %317 : vector<16x32xf32>
    %319 = arith.mulf %318, %318 : vector<16x32xf32>
    %cst_131 = arith.constant dense<0.000000e+00> : vector<16xf32>
    %320 = vector.multi_reduction <add>, %319, %cst_131 [1] : vector<16x32xf32> to vector<16xf32>
    %321 = vector.shape_cast %320 : vector<16xf32> to vector<16x1xf32>
    %cst_132 = arith.constant 3.200000e+01 : f32
    %322 = vector.broadcast %cst_132 : f32 to vector<16x1xf32>
    %323 = arith.divf %321, %322 : vector<16x1xf32>
    %cst_133 = arith.constant 9.99999974E-6 : f32
    %324 = vector.broadcast %cst_133 : f32 to vector<16x1xf32>
    %325 = arith.addf %323, %324 : vector<16x1xf32>
    %326 = math.rsqrt %325 : vector<16x1xf32>
    %327 = vector.broadcast %326 : vector<16x1xf32> to vector<16x32xf32>
    %328 = arith.mulf %318, %327 : vector<16x32xf32>
    %329 = vector.broadcast %310 : vector<1x32xf32> to vector<16x32xf32>
    %330 = arith.mulf %328, %329 : vector<16x32xf32>
    %331 = vector.broadcast %312 : vector<1x32xf32> to vector<16x32xf32>
    %332 = arith.addf %330, %331 : vector<16x32xf32>
    %c1_134 = arith.constant 1 : index
    %c0_135 = arith.constant 0 : index
    %c0_136 = arith.constant 0 : index
    %333 = vector.load %arg9[%c1_134, %c0_135, %c0_136] : memref<2x32x128xf32, #tpu.memory_space<vmem>>, vector<1x32x128xf32>
    %334 = vector.shape_cast %333 : vector<1x32x128xf32> to vector<32x128xf32>
    %cst_137 = arith.constant dense<0.000000e+00> : vector<16x128xf32>
    %335 = tpu.matmul %332, %334, %cst_137 {dimension_numbers = #tpu.dot_dimension_numbers<[1], [0], [0], [1], [0, 0, 1, 1], [], []>} : vector<16x32xf32>, vector<32x128xf32>, vector<16x128xf32> -> vector<16x128xf32>
    %c1_138 = arith.constant 1 : index
    %c0_139 = arith.constant 0 : index
    %c0_140 = arith.constant 0 : index
    %336 = vector.load %arg10[%c1_138, %c0_139, %c0_140] : memref<2x1x128xf32, #tpu.memory_space<vmem>>, vector<1x1x128xf32>
    %337 = vector.shape_cast %336 : vector<1x1x128xf32> to vector<1x128xf32>
    %338 = vector.broadcast %337 : vector<1x128xf32> to vector<16x128xf32>
    %339 = arith.addf %335, %338 : vector<16x128xf32>
    %cst_141 = arith.constant 5.000000e-01 : f32
    %340 = vector.broadcast %cst_141 : f32 to vector<16x128xf32>
    %341 = arith.mulf %340, %339 : vector<16x128xf32>
    %cst_142 = arith.constant 4.471500e-02 : f32
    %342 = vector.broadcast %cst_142 : f32 to vector<16x128xf32>
    %343 = arith.mulf %342, %339 : vector<16x128xf32>
    %344 = arith.mulf %343, %339 : vector<16x128xf32>
    %345 = arith.mulf %344, %339 : vector<16x128xf32>
    %346 = arith.addf %339, %345 : vector<16x128xf32>
    %cst_143 = arith.constant 0.797884583 : f32
    %347 = vector.broadcast %cst_143 : f32 to vector<16x128xf32>
    %348 = arith.mulf %347, %346 : vector<16x128xf32>
    %349 = math.tanh %348 : vector<16x128xf32>
    %cst_144 = arith.constant 1.000000e+00 : f32
    %350 = vector.broadcast %cst_144 : f32 to vector<16x128xf32>
    %351 = arith.addf %350, %349 : vector<16x128xf32>
    %352 = arith.mulf %341, %351 : vector<16x128xf32>
    %c1_145 = arith.constant 1 : index
    %c0_146 = arith.constant 0 : index
    %c0_147 = arith.constant 0 : index
    %353 = vector.load %arg11[%c1_145, %c0_146, %c0_147] : memref<2x128x32xf32, #tpu.memory_space<vmem>>, vector<1x128x32xf32>
    %354 = vector.shape_cast %353 : vector<1x128x32xf32> to vector<128x32xf32>
    %cst_148 = arith.constant dense<0.000000e+00> : vector<16x32xf32>
    %355 = tpu.matmul %352, %354, %cst_148 {dimension_numbers = #tpu.dot_dimension_numbers<[1], [0], [0], [1], [0, 0, 1, 1], [], []>} : vector<16x128xf32>, vector<128x32xf32>, vector<16x32xf32> -> vector<16x32xf32>
    %356 = arith.addf %308, %355 : vector<16x32xf32>
    %c1_149 = arith.constant 1 : index
    %c0_150 = arith.constant 0 : index
    %c0_151 = arith.constant 0 : index
    %357 = vector.load %arg12[%c1_149, %c0_150, %c0_151] : memref<2x1x32xf32, #tpu.memory_space<vmem>>, vector<1x1x32xf32>
    %358 = vector.shape_cast %357 : vector<1x1x32xf32> to vector<1x32xf32>
    %359 = vector.broadcast %358 : vector<1x32xf32> to vector<16x32xf32>
    %360 = arith.addf %356, %359 : vector<16x32xf32>
    %c0_152 = arith.constant 0 : index
    %c0_153 = arith.constant 0 : index
    %c0_154 = arith.constant 0 : index
    %361 = vector.load %arg13[%c0_152, %c0_153, %c0_154] : memref<2x1x32xf32, #tpu.memory_space<vmem>>, vector<1x1x32xf32>
    %362 = vector.shape_cast %361 : vector<1x1x32xf32> to vector<1x32xf32>
    %c1_155 = arith.constant 1 : index
    %c0_156 = arith.constant 0 : index
    %c0_157 = arith.constant 0 : index
    %363 = vector.load %arg13[%c1_155, %c0_156, %c0_157] : memref<2x1x32xf32, #tpu.memory_space<vmem>>, vector<1x1x32xf32>
    %364 = vector.shape_cast %363 : vector<1x1x32xf32> to vector<1x32xf32>
    %cst_158 = arith.constant dense<0.000000e+00> : vector<16xf32>
    %365 = vector.multi_reduction <add>, %360, %cst_158 [1] : vector<16x32xf32> to vector<16xf32>
    %366 = vector.shape_cast %365 : vector<16xf32> to vector<16x1xf32>
    %cst_159 = arith.constant 3.200000e+01 : f32
    %367 = vector.broadcast %cst_159 : f32 to vector<16x1xf32>
    %368 = arith.divf %366, %367 : vector<16x1xf32>
    %369 = vector.broadcast %368 : vector<16x1xf32> to vector<16x32xf32>
    %370 = arith.subf %360, %369 : vector<16x32xf32>
    %371 = arith.mulf %370, %370 : vector<16x32xf32>
    %cst_160 = arith.constant dense<0.000000e+00> : vector<16xf32>
    %372 = vector.multi_reduction <add>, %371, %cst_160 [1] : vector<16x32xf32> to vector<16xf32>
    %373 = vector.shape_cast %372 : vector<16xf32> to vector<16x1xf32>
    %cst_161 = arith.constant 3.200000e+01 : f32
    %374 = vector.broadcast %cst_161 : f32 to vector<16x1xf32>
    %375 = arith.divf %373, %374 : vector<16x1xf32>
    %cst_162 = arith.constant 9.99999974E-6 : f32
    %376 = vector.broadcast %cst_162 : f32 to vector<16x1xf32>
    %377 = arith.addf %375, %376 : vector<16x1xf32>
    %378 = math.rsqrt %377 : vector<16x1xf32>
    %379 = vector.broadcast %378 : vector<16x1xf32> to vector<16x32xf32>
    %380 = arith.mulf %370, %379 : vector<16x32xf32>
    %381 = vector.broadcast %362 : vector<1x32xf32> to vector<16x32xf32>
    %382 = arith.mulf %380, %381 : vector<16x32xf32>
    %383 = vector.broadcast %364 : vector<1x32xf32> to vector<16x32xf32>
    %384 = arith.addf %382, %383 : vector<16x32xf32>
    %c0_163 = arith.constant 0 : index
    %c0_164 = arith.constant 0 : index
    %385 = vector.load %arg14[%c0_163, %c0_164] : memref<32x128xf32, #tpu.memory_space<vmem>>, vector<32x128xf32>
    %cst_165 = arith.constant dense<0.000000e+00> : vector<16x128xf32>
    %386 = tpu.matmul %384, %385, %cst_165 {dimension_numbers = #tpu.dot_dimension_numbers<[1], [0], [0], [1], [0, 0, 1, 1], [], []>} : vector<16x32xf32>, vector<32x128xf32>, vector<16x128xf32> -> vector<16x128xf32>
    %c0_166 = arith.constant 0 : index
    %c0_167 = arith.constant 0 : index
    %387 = vector.load %arg15[%c0_166, %c0_167] : memref<16x128xf32, #tpu.memory_space<vmem>>, vector<16x128xf32>
    tpu.vector_store %arg15[%c0_166, %c0_167], %386 {strides = array<i32>} : memref<16x128xf32, #tpu.memory_space<vmem>>, vector<16x128xf32>,
    return
  }
  func.func @transform_0(%arg0: i32) -> (i32, i32) {
    %c0_i32 = arith.constant 0 : i32
    %c0_i32_0 = arith.constant 0 : i32
    %c0_i32_1 = arith.constant 0 : i32
    return %c0_i32, %c0_i32_0 : i32, i32
  }
  func.func @transform_1(%arg0: i32) -> (i32, i32) {
    %c0_i32 = arith.constant 0 : i32
    %c0_i32_0 = arith.constant 0 : i32
    %c0_i32_1 = arith.constant 0 : i32
    return %c0_i32, %c0_i32_0 : i32, i32
  }
  func.func @transform_2(%arg0: i32) -> (i32, i32) {
    %c0_i32 = arith.constant 0 : i32
    %c0_i32_0 = arith.constant 0 : i32
    %c0_i32_1 = arith.constant 0 : i32
    return %c0_i32, %c0_i32_0 : i32, i32
  }
  func.func @transform_3(%arg0: i32) -> (i32, i32, i32) {
    %c0_i32 = arith.constant 0 : i32
    %c0_i32_0 = arith.constant 0 : i32
    %c0_i32_1 = arith.constant 0 : i32
    %c0_i32_2 = arith.constant 0 : i32
    return %c0_i32, %c0_i32_0, %c0_i32_1 : i32, i32, i32
  }
  func.func @transform_4(%arg0: i32) -> (i32, i32, i32) {
    %c0_i32 = arith.constant 0 : i32
    %c0_i32_0 = arith.constant 0 : i32
    %c0_i32_1 = arith.constant 0 : i32
    %c0_i32_2 = arith.constant 0 : i32
    return %c0_i32, %c0_i32_0, %c0_i32_1 : i32, i32, i32
  }
  func.func @transform_5(%arg0: i32) -> (i32, i32, i32) {
    %c0_i32 = arith.constant 0 : i32
    %c0_i32_0 = arith.constant 0 : i32
    %c0_i32_1 = arith.constant 0 : i32
    %c0_i32_2 = arith.constant 0 : i32
    return %c0_i32, %c0_i32_0, %c0_i32_1 : i32, i32, i32
  }
  func.func @transform_6(%arg0: i32) -> (i32, i32, i32) {
    %c0_i32 = arith.constant 0 : i32
    %c0_i32_0 = arith.constant 0 : i32
    %c0_i32_1 = arith.constant 0 : i32
    %c0_i32_2 = arith.constant 0 : i32
    return %c0_i32, %c0_i32_0, %c0_i32_1 : i32, i32, i32
  }
  func.func @transform_7(%arg0: i32) -> (i32, i32, i32, i32) {
    %c0_i32 = arith.constant 0 : i32
    %c0_i32_0 = arith.constant 0 : i32
    %c0_i32_1 = arith.constant 0 : i32
    %c0_i32_2 = arith.constant 0 : i32
    %c0_i32_3 = arith.constant 0 : i32
    return %c0_i32, %c0_i32_0, %c0_i32_1, %c0_i32_2 : i32, i32, i32, i32
  }
  func.func @transform_8(%arg0: i32) -> (i32, i32, i32) {
    %c0_i32 = arith.constant 0 : i32
    %c0_i32_0 = arith.constant 0 : i32
    %c0_i32_1 = arith.constant 0 : i32
    %c0_i32_2 = arith.constant 0 : i32
    return %c0_i32, %c0_i32_0, %c0_i32_1 : i32, i32, i32
  }
  func.func @transform_9(%arg0: i32) -> (i32, i32, i32) {
    %c0_i32 = arith.constant 0 : i32
    %c0_i32_0 = arith.constant 0 : i32
    %c0_i32_1 = arith.constant 0 : i32
    %c0_i32_2 = arith.constant 0 : i32
    return %c0_i32, %c0_i32_0, %c0_i32_1 : i32, i32, i32
  }
  func.func @transform_10(%arg0: i32) -> (i32, i32, i32) {
    %c0_i32 = arith.constant 0 : i32
    %c0_i32_0 = arith.constant 0 : i32
    %c0_i32_1 = arith.constant 0 : i32
    %c0_i32_2 = arith.constant 0 : i32
    return %c0_i32, %c0_i32_0, %c0_i32_1 : i32, i32, i32
  }
  func.func @transform_11(%arg0: i32) -> (i32, i32, i32) {
    %c0_i32 = arith.constant 0 : i32
    %c0_i32_0 = arith.constant 0 : i32
    %c0_i32_1 = arith.constant 0 : i32
    %c0_i32_2 = arith.constant 0 : i32
    return %c0_i32, %c0_i32_0, %c0_i32_1 : i32, i32, i32
  }
  func.func @transform_12(%arg0: i32) -> (i32, i32, i32) {
    %c0_i32 = arith.constant 0 : i32
    %c0_i32_0 = arith.constant 0 : i32
    %c0_i32_1 = arith.constant 0 : i32
    %c0_i32_2 = arith.constant 0 : i32
    return %c0_i32, %c0_i32_0, %c0_i32_1 : i32, i32, i32
  }
  func.func @transform_13(%arg0: i32) -> (i32, i32) {
    %c0_i32 = arith.constant 0 : i32
    %c0_i32_0 = arith.constant 0 : i32
    %c0_i32_1 = arith.constant 0 : i32
    return %c0_i32, %c0_i32_0 : i32, i32
  }
  func.func @transform_14(%arg0: i32) -> (i32, i32) {
    %c0_i32 = arith.constant 0 : i32
    %c0_i32_0 = arith.constant 0 : i32
    %c0_i32_1 = arith.constant 0 : i32
    return %c0_i32, %c0_i32_0 : i32, i32
  }
}

</mosaic_0001>

<bundles_post_ra>
// kernel: teacher_forward.1
= control target key start
LH: loop header
LB: loop body
LE: loop exit
PB: predicated region body
PF: predicated region fallthrough
CT: control target
= control target key end

     0   :  { %v4916_v2 = vmov 0   ;;  %s5739_s0 = inlined_call_operand.vmem [shape: s32[16,1], index: 0, kind: input, shape index: {}]   ;;  %s5740_s1 = inlined_call_operand.vmem [shape: f32[128,32], index: 1, kind: input, shape index: {}]   ;;  %s5741_s2 = inlined_call_operand.vmem [shape: f32[64,32], index: 2, kind: input, shape index: {}]   ;;  %s5742_s3 = inlined_call_operand.vmem [shape: f32[2,32,96], index: 3, kind: input, shape index: {}]   ;;  %s5743_s4 = inlined_call_operand.vmem [shape: f32[2,1,96], index: 4, kind: input, shape index: {}]   ;;  %s5744_s5 = inlined_call_operand.vmem [shape: f32[2,32,32], index: 5, kind: input, shape index: {}]   ;;  %s5745_s6 = inlined_call_operand.vmem [shape: f32[2,1,32], index: 6, kind: input, shape index: {}]   ;;  %s5746_s7 = inlined_call_operand.vmem [shape: f32[2,4,1,32], index: 7, kind: input, shape index: {}]   ;;  %s5747_s8 = inlined_call_operand.vmem [shape: f32[2,32,128], index: 8, kind: input, shape index: {}]   ;;  %s5748_s9 = inlined_call_operand.vmem [shape: f32[2,1,128], index: 9, kind: input, shape index: {}]   ;;  %s5749_s10 = inlined_call_operand.vmem [shape: f32[2,128,32], index: 10, kind: input, shape index: {}]   ;;  %s5750_s11 = inlined_call_operand.vmem [shape: f32[2,1,32], index: 11, kind: input, shape index: {}]   ;;  %s5751_s12 = inlined_call_operand.vmem [shape: f32[2,1,32], index: 12, kind: input, shape index: {}]   ;;  %s5752_s13 = inlined_call_operand.vmem [shape: f32[32,128], index: 13, kind: input, shape index: {}]   ;;  %s5753_s14 = inlined_call_operand.hbm [shape: f32[16,128], index: 14, kind: output, shape index: {}]  }
   0x1   :  { %v48_v0 = vld [vmem:[%s5739_s0] sm:$0xff]  ;;  %4799 = vset.pattern.permute.xlu0 %v4916_v2  ;;  %v66_v3 = vld [vmem:[%s5740_s1 + $0x8] sm:$0xff]  ;;  %v67_v4 = vld [vmem:[%s5740_s1 + $0x10] sm:$0xff] }
   0x2   :  { %v65_v1 = vld [vmem:[%s5740_s1] sm:$0xff]  ;;  %v68_v5 = vld [vmem:[%s5740_s1 + $0x18] sm:$0xff]  ;;  %53 = vperm.xlu0 %4799, %v48_v0   ;;  %v49_v8 = vld [vmem:[%s5739_s0 + $0x8] sm:$0xff] }
   0x3   :  { %v4626_v6 = vpack.c.bf16 %v66_v3, %v65_v1  ;;  %v4630_v7 = vpack.c.bf16 %v68_v5, %v67_v4  ;;  %v69_v9 = vld [vmem:[%s5740_s1 + $0x20] sm:$0xff]  ;;  %v70_v10 = vld [vmem:[%s5740_s1 + $0x28] sm:$0xff] }
   0x4   :  { %v4634_v11 = vpack.c.bf16 %v70_v10, %v69_v9 }
   0x5   :  { %4627 = vmatprep.subr.bf16.mxu0 %v4626_v6 }
   0x6   :  { %4629 = vmatpush3.bf16.msra.mxu0 %v4626_v6  ;;  %56 = vperm.xlu0 %4799, %v49_v8  }
   0x7   :  { %4631 = vmatprep.subr.bf16.mxu0 %v4630_v7 }
   0x8   :  { %19 = vsyncpa [#allocation3], 0  ;;  %v71_v12 = vld [vmem:[%s5740_s1 + $0x30] sm:$0xff]  ;;  %v72_v13 = vld [vmem:[%s5740_s1 + $0x38] sm:$0xff]  ;;  %v50_v27 = vlaneseq  ;;  %v4917_v30 = vmov 1.0   ;;  %vm163_vm2 = vcmask 261120  }
   0x9   :  { %v4638_v14 = vpack.c.bf16 %v72_v13, %v71_v12  ;;  %v73_v15 = vld [vmem:[%s5740_s1 + $0x40] sm:$0xff]  ;;  %v74_v16 = vld [vmem:[%s5740_s1 + $0x48] sm:$0xff]  ;;  %v75_v18 = vld [vmem:[%s5740_s1 + $0x50] sm:$0xff]  ;;  %vm4919_vm3 = vmmov 0   ;;  %s4920_s29 = smov 96   ;;  %vm302_vm4 = vcmask 64512  }
   0xa   :  { %4633 = vmatpush3.bf16.msra.mxu0 %v4630_v7  ;;  %v4642_v17 = vpack.c.bf16 %v74_v16, %v73_v15  ;;  %v76_v19 = vld [vmem:[%s5740_s1 + $0x58] sm:$0xff]  ;;  %v77_v21 = vld [vmem:[%s5740_s1 + $0x60] sm:$0xff]  ;;  %v78_v22 = vld [vmem:[%s5740_s1 + $0x68] sm:$0xff]  ;;  %v5067_v28 = vand.u32 127, %v50_v27  ;;  %v4918_v7 = vmov 0.0   ;;  %v157_v15 = vshrl.u32 %v50_v27, 7 }
   0xb   :  { %4635 = vmatprep.subr.bf16.mxu0 %v4634_v11  ;;  %v4646_v20 = vpack.c.bf16 %v76_v19, %v75_v18  ;;  %v4650_v23 = vpack.c.bf16 %v78_v22, %v77_v21  ;;  %v79_v24 = vld [vmem:[%s5740_s1 + $0x70] sm:$0xff]  ;;  %v80_v25 = vld [vmem:[%s5740_s1 + $0x78] sm:$0xff]  ;;  %v64_v32 = vld [vmem:[%s5741_s2] sm:$0xff]  ;;  %v4921_v16 = vmov -1e+30   ;;  %s4922_s30 = smov 64  }
   0xc   :  { %v4654_v26 = vpack.c.bf16 %v80_v25, %v79_v24  ;;  %v207_v49 = vld [vmem:[%s5742_s3] sm:$0xff]  ;;  %v208_v50 = vld [vmem:[%s5742_s3 + $0x8] sm:$0xff]  ;;  %v209_v51 = vld [vmem:[%s5742_s3 + $0x10] sm:$0xff]  ;;  %vm158_vm5 = vcmp.le.s32.totalorder %v5067_v28, %v157_v15  ;;  %s4923_s15 = smov 88   ;;  %s4924_s1 = smov 120   ;;  %vm1647_vm6 = vcmask 195584  }
   0xd   :  { %v4658_v52 = vpack.c.bf16 %v208_v50, %v207_v49  ;;  %v210_v53 = vld [vmem:[%s5742_s3 + $0x18] sm:$0xff]  ;;  %v4005_v62 = vld [vmem:[%s5746_s7] ss:$0 sm:$0xff]  ;;  %v4006_v0 = vld [vmem:[%s5746_s7 + $0x1] ss:$0 sm:$0xff]  ;;  %s4925_s0 = smov 56  }
   0xe   :  { %4637 = vmatpush3.bf16.msra.mxu0 %v4634_v11  ;;  %v4662_v54 = vpack.c.bf16 %v210_v53, %v209_v51  ;;  %v4007_v8 = vld [vmem:[%s5743_s4] ss:$0 sm:$0xff]  ;;  %s4926_s2 = smov 80   ;;  %s4927_s16 = smov 112   ;;  %vm1644_vm7 = vcmask 130048  }
   0xf   :  { %4639 = vmatprep.subr.bf16.mxu0 %v4638_v14  ;;  %4659 = vmatprep.subr.bf16.mxu1 %v4658_v52  ;;  %s4928_s17 = smov 48   ;;  %s4929_s18 = smov 72  }
  0x10   :  { %4661 = vmatpush3.bf16.msra.mxu1 %v4658_v52  ;;  %s5762_s19 = smov 104   ;;  %s5760_s20 = smov 40  }
  0x11   :  { %4663 = vmatprep.subr.bf16.mxu1 %v4662_v54  ;;  %s5756_s21 = smov 8   ;;  %s5754_s22 = smov 16  }
  0x12   :  { %4641 = vmatpush3.bf16.msra.mxu0 %v4638_v14  ;;  %s5758_s23 = smov 24  }
  0x13   :  { %4643 = vmatprep.subr.bf16.mxu0 %v4642_v17 }
  0x14   :  { %4665 = vmatpush3.bf16.msra.mxu1 %v4662_v54 }
  0x15   :  { %4330 = vmatprep.subr.mxu1 %v4918_v7 }
  0x16   :  { %4645 = vmatpush3.bf16.msra.mxu0 %v4642_v17  ;;  %v5137_v17 = vsel %vm158_vm5, 0.0, %v4921_v16 }
  0x17   :  { %4647 = vmatprep.subr.bf16.mxu0 %v4646_v20 }
  0x1a   :  { %4649 = vmatpush3.bf16.msra.mxu0 %v4646_v20 }
  0x1b   :  { %4651 = vmatprep.subr.bf16.mxu0 %v4650_v23 }
  0x1e   :  { %4653 = vmatpush3.bf16.msra.mxu0 %v4650_v23 }
  0x1f   :  { %4655 = vmatprep.subr.bf16.mxu0 %v4654_v26 }
  0x22   :  { %4657 = vmatpush3.bf16.msra.mxu0 %v4654_v26 }
  0x23   :  { %4370 = vmatprep.subr.mxu0 %v4918_v7 }
  0x81   :  { %v54_v29 = vpop.permute.xlu0 %53 }
  0x82   :  { %vm58_vm0 = vcmp.eq.s32.totalorder %v5067_v28, %v54_v29 }
  0x83   :  { %4316 = vmatprep.mubr.msk.f32.mxu0 %vm58_vm0, %v4917_v30 }
  0x85   :  { %v57_v31 = vpop.permute.xlu0 %56 }
  0x86   :  { %vm59_vm1 = vcmp.eq.s32.totalorder %v5067_v28, %v57_v31 }
  0x87   :  { %4317 = vmatmul.mubr.msk.f32.vlgmr.msra.gmra.mrb[0].mxu0 %vm59_vm1, %v4917_v30 }
  0x88   :  { %4372 = vmatprep.mubr.msk.f32.mxu0 %vm4919_vm3, %v4918_v7 }
 0x15a   :  { %v4318_v33 = vpop.f32.mrb[0].mxu0 }
 0x15b   :  { %v147_v34 = vpop.f32.mrb[1].mxu0  ;;  %v5076_v36 = vadd.f32 %v4318_v33, %v64_v32 }
 0x15c   :  { %v5074_v35 = vadd.f32 %v147_v34, %v64_v32 }
 0x15d   :  { %v167_v38 = vsel %vm163_vm2, %v5076_v36, 0.0 }
 0x15e   :  { %v164_v37 = vsel %vm163_vm2, %v5074_v35, 0.0 }
 0x15f   :  { %165 = vadd.xlane.f32.xlu1 %v164_v37 }
 0x163   :  { %168 = vadd.xlane.f32.xlu1 %v167_v38 }
 0x1ec   :  { %v166_v39 = vpop.xlane.xlu1 %165 }
 0x1ed   :  { %v171_v40 = vmul.f32 0.03125, %v166_v39 }
 0x1ef   :  { %v173_v41 = vsub.f32 %v5074_v35, %v171_v40 }
 0x1f0   :  { %v169_v42 = vpop.xlane.xlu1 %168 }
 0x1f1   :  { %v172_v43 = vmul.f32 0.03125, %v169_v42  ;;  %v175_v44 = vmul.f32 %v173_v41, %v173_v41 }
 0x1f3   :  { %v174_v45 = vsub.f32 %v5076_v36, %v172_v43  ;;  %v177_v46 = vsel %vm163_vm2, %v175_v44, 0.0 }
 0x1f4   :  { %178 = vadd.xlane.f32.xlu0 %v177_v46 }
 0x1f5   :  { %v176_v47 = vmul.f32 %v174_v45, %v174_v45 }
 0x1f7   :  { %v180_v48 = vsel %vm163_vm2, %v176_v47, 0.0 }
 0x1f8   :  { %181 = vadd.xlane.f32.xlu1 %v180_v48 }
 0x281   :  { %v179_v55 = vpop.xlane.xlu0 %178 }
 0x282   :  { %v183_v56 = vmul.f32 0.03125, %v179_v55 }
 0x284   :  { %v185_v57 = vadd.f32 1e-05, %v183_v56 }
 0x285   :  { %v182_v58 = vpop.xlane.xlu1 %181 }
 0x286   :  { %4800 = vrsqrt.f32 %v185_v57  ;;  %v184_v59 = vmul.f32 0.03125, %v182_v58 }
 0x288   :  { %v186_v60 = vadd.f32 1e-05, %v184_v59 }
 0x28a   :  { %4802 = vrsqrt.f32 %v186_v60 }
 0x290   :  { %v4801_v61 = vpop.eup %4800 }
 0x291   :  { %v189_v63 = vmul.f32 %v4801_v61, %v173_v41 }
 0x293   :  { %v197_v1 = vmul.f32 %v4005_v62, %v189_v63 }
 0x294   :  { %v4803_v2 = vpop.eup %4802 }
 0x295   :  { %v190_v3 = vmul.f32 %v4803_v2, %v174_v45  ;;  %v205_v4 = vadd.f32 %v4006_v0, %v197_v1 }
 0x297   :  { %v198_v5 = vmul.f32 %v4005_v62, %v190_v3  ;;  %4327 = vmatprep.mubr.msk.f32.mxu1 %vm163_vm2, %v205_v4 }
 0x299   :  { %v206_v6 = vadd.f32 %v4006_v0, %v198_v5 }
 0x29b   :  { %4328 = vmatmul.mubr.msk.f32.vlgmr.msra.gmra.mrb[0].mxu1 %vm163_vm2, %v206_v6 }
 0x29c   :  { %4332 = vmatprep.mubr.msk.f32.mxu1 %vm4919_vm3, %v4918_v7 }
 0x36e   :  { %v4329_v9 = vpop.f32.mrb[0].mxu1 }
 0x36f   :  { %v290_v10 = vpop.f32.mrb[1].mxu1  ;;  %v5119_v12 = vadd.f32 %v4329_v9, %v4007_v8 }
 0x370   :  { %v5115_v11 = vadd.f32 %v4007_v8, %v290_v10 }
 0x372   :  { %300 = vrot.lane.b32.xlu1 %v5115_v11, %s4920_s29 }
 0x376   :  { %378 = vrot.lane.b32.xlu1 %v5119_v12, %s4920_s29 }
 0x3e4   :  { %v301_v13 = vpop.permute.xlu1 %300 }
 0x3e5   :  { %4331 = vmatpush3.xpose.msk.msra.mxu1 %vm302_vm4, %v301_v13 }
 0x3e6   :  { %4335 = vmatprep.subr.mxu1 %v4918_v7 }
 0x3e8   :  { %4333 = vmatmul.mubr.msk.f32.vlgmr.msra.gmra.mrb[2].mxu1 %vm302_vm4, %v5115_v11  ;;  %v379_v14 = vpop.permute.xlu1 %378 }
 0x3e9   :  { %4336 = vmatpush3.xpose.msk.msra.mxu1 %vm302_vm4, %v379_v14  ;;  %4337 = vmatprep.mubr.msk.f32.mxu1 %vm4919_vm3, %v4918_v7 }
 0x3ea   :  { %4340 = vmatprep.subr.mxu1 %v4918_v7 }
 0x3ec   :  { %4338 = vmatmul.mubr.msk.f32.vlgmr.msra.gmra.mrb[4].mxu1 %vm302_vm4, %v5119_v12 }
 0x3ed   :  { %4342 = vmatprep.mubr.msk.f32.mxu1 %vm4919_vm3, %v4918_v7 }
 0x4bb   :  { %v373_v18 = vpop.f32.mrb[2].mxu1 }
 0x4bc   :  { %v374_v19 = vadd.f32 %v373_v18, %v5137_v17  ;;  %v4334_v20 = vpop.f32.mrb[3].mxu1 }
 0x4be   :  { %v454_v21 = vsel %vm302_vm4, %v374_v19, -inf }
 0x4bf   :  { %455 = vmax.xlane.f32.xlu1 %v454_v21  ;;  %v450_v22 = vpop.f32.mrb[4].mxu1 }
 0x4c0   :  { %v451_v23 = vadd.f32 %v450_v22, %v5137_v17  ;;  %v4339_v24 = vpop.f32.mrb[5].mxu1 }
 0x4c2   :  { %v457_v25 = vsel %vm302_vm4, %v451_v23, -inf }
 0x4c3   :  { %458 = vmax.xlane.f32.xlu0 %v457_v25 }
 0x4d0   :  { %552 = vrot.lane.b32.xlu1 %v5119_v12, %s4922_s30 }
 0x4d9   :  { %476 = vrot.lane.b32.xlu0 %v5115_v11, %s4922_s30 }
 0x4dd   :  { %630 = vrot.lane.b32.xlu0 %v5115_v11, %s4923_s15 }
 0x54c   :  { %v456_v26 = vpop.xlane.xlu1 %455 }
 0x54d   :  { %v460_v27 = vsub.f32 %v374_v19, %v456_v26 }
 0x54f   :  { %v462_v28 = vmul.f32 1.442695, %v460_v27 }
 0x550   :  { %v459_v29 = vpop.xlane.xlu0 %458  ;;  %v553_v44 = vpop.permute.xlu1 %552 }
 0x551   :  { %4804 = vpow2.f32 %v462_v28  ;;  %v461_v30 = vsub.f32 %v451_v23, %v459_v29 }
 0x553   :  { %v464_v31 = vmul.f32 1.442695, %v461_v30 }
 0x554   :  { %v477_v32 = vpop.permute.xlu0 %476 }
 0x555   :  { %4806 = vpow2.f32 %v464_v31  ;;  %4341 = vmatpush3.msra.mxu1 %v477_v32 }
 0x556   :  { %4345 = vmatprep.subr.mxu1 %v4918_v7 }
 0x558   :  { %v631_v39 = vpop.permute.xlu0 %630 }
 0x55b   :  { %v4805_v33 = vpop.eup %4804 }
 0x55c   :  { %v466_v34 = vsel %vm302_vm4, %v4805_v33, 0.0 }
 0x55d   :  { %467 = vadd.xlane.f32.xlu0 %v466_v34 }
 0x55f   :  { %v4807_v37 = vpop.eup %4806 }
 0x560   :  { %v469_v38 = vsel %vm302_vm4, %v4807_v37, 0.0 }
 0x561   :  { %470 = vadd.xlane.f32.xlu0 %v469_v38 }
 0x577   :  { %628 = vrot.lane.b32.xlu0 %v5115_v11, %s4924_s1 }
 0x57b   :  { %708 = vrot.lane.b32.xlu0 %v5119_v12, %s4923_s15 }
 0x57f   :  { %706 = vrot.lane.b32.xlu0 %v5119_v12, %s4924_s1 }
 0x5ea   :  { %v468_v40 = vpop.xlane.xlu0 %467 }
 0x5eb   :  { %4808 = vrcp.f32 %v468_v40 }
 0x5ee   :  { %v471_v41 = vpop.xlane.xlu0 %470 }
 0x5ef   :  { %4810 = vrcp.f32 %v471_v41 }
 0x5f2   :  { %v629_v46 = vpop.permute.xlu0 %628 }
 0x5f5   :  { %v4809_v42 = vpop.eup %4808 }
 0x5f6   :  { %v474_v43 = vmul.f32 %v4809_v42, %v4805_v33  ;;  %v709_v48 = vpop.permute.xlu0 %708 }
 0x5f8   :  { %4343 = vmatmul.mubr.msk.f32.vlgmr.msra.gmra.mrb[6].mxu1 %vm302_vm4, %v474_v43 }
 0x5f9   :  { %v4811_v45 = vpop.eup %4810  ;;  %4346 = vmatpush3.msra.mxu1 %v553_v44  ;;  %4347 = vmatprep.mubr.msk.f32.mxu1 %vm4919_vm3, %v4918_v7 }
 0x5fa   :  { %v475_v47 = vmul.f32 %v4811_v45, %v4807_v37  ;;  %4350 = vmatprep.subr.mxu1 %v4918_v7  ;;  %v707_v49 = vpop.permute.xlu0 %706 }
 0x5fc   :  { %4348 = vmatmul.mubr.msk.f32.vlgmr.msra.gmra.mrb[8].mxu1 %vm302_vm4, %v475_v47 }
 0x5fd   :  { %4352 = vmatprep.mubr.msk.f32.mxu1 %vm4919_vm3, %v4918_v7 }
 0x600   :  { %4351 = vmatpush3.xpose.msk.msra.mxu1 %vm302_vm4, %v631_v39 }
 0x601   :  { %4355 = vmatprep.subr.mxu1 %v4918_v7 }
 0x603   :  { %4353 = vmatmul.mubr.msk.f32.vlgmr.msra.gmra.mrb[10].mxu1 %vm302_vm4, %v629_v46 }
 0x604   :  { %4356 = vmatpush3.xpose.msk.msra.mxu1 %vm302_vm4, %v709_v48  ;;  %4357 = vmatprep.mubr.msk.f32.mxu1 %vm4919_vm3, %v4918_v7 }
 0x605   :  { %4360 = vmatprep.subr.mxu1 %v4918_v7 }
 0x607   :  { %4358 = vmatmul.mubr.msk.f32.vlgmr.msra.gmra.mrb[12].mxu1 %vm302_vm4, %v707_v49 }
 0x608   :  { %4362 = vmatprep.mubr.msk.f32.mxu1 %vm4919_vm3, %v4918_v7 }
 0x6cb   :  { %v5175_v50 = vpop.f32.mrb[6].mxu1 }
 0x6cc   :  { %v4344_v51 = vpop.f32.mrb[7].mxu1 }
 0x6cf   :  { %v5177_v52 = vpop.f32.mrb[8].mxu1 }
 0x6d0   :  { %v4349_v53 = vpop.f32.mrb[9].mxu1 }
 0x6d6   :  { %v702_v54 = vpop.f32.mrb[10].mxu1 }
 0x6d7   :  { %v703_v55 = vadd.f32 %v702_v54, %v5137_v17  ;;  %v4354_v56 = vpop.f32.mrb[11].mxu1 }
 0x6d9   :  { %v784_v57 = vsel %vm302_vm4, %v703_v55, -inf }
 0x6da   :  { %785 = vmax.xlane.f32.xlu1 %v784_v57  ;;  %v780_v58 = vpop.f32.mrb[12].mxu1 }
 0x6db   :  { %v781_v59 = vadd.f32 %v780_v58, %v5137_v17  ;;  %v4359_v60 = vpop.f32.mrb[13].mxu1 }
 0x6dd   :  { %v787_v61 = vsel %vm302_vm4, %v781_v59, -inf }
 0x6de   :  { %788 = vmax.xlane.f32.xlu0 %v787_v61 }
 0x6eb   :  { %882 = vrot.lane.b32.xlu1 %v5119_v12, %s4925_s0 }
 0x6ef   :  { %960 = vrot.lane.b32.xlu1 %v5115_v11, %s4926_s2 }
 0x767   :  { %v786_v62 = vpop.xlane.xlu1 %785 }
 0x768   :  { %v790_v63 = vsub.f32 %v703_v55, %v786_v62 }
 0x76a   :  { %v792_v0 = vmul.f32 1.442695, %v790_v63 }
 0x76b   :  { %v883_v1 = vpop.permute.xlu1 %882  ;;  %v789_v2 = vpop.xlane.xlu0 %788 }
 0x76c   :  { %4812 = vpow2.f32 %v792_v0  ;;  %v791_v3 = vsub.f32 %v781_v59, %v789_v2 }
 0x76e   :  { %v794_v4 = vmul.f32 1.442695, %v791_v3 }
 0x76f   :  { %v961_v5 = vpop.permute.xlu1 %960 }
 0x770   :  { %4814 = vpow2.f32 %v794_v4  ;;  %4371 = vmatpush3.xpose.msk.msra.mxu0 %vm302_vm4, %v961_v5 }
 0x771   :  { %4380 = vmatprep.subr.mxu0 %v4918_v7 }
 0x776   :  { %v4813_v6 = vpop.eup %4812 }
 0x777   :  { %v796_v8 = vsel %vm302_vm4, %v4813_v6, 0.0 }
 0x778   :  { %797 = vadd.xlane.f32.xlu0 %v796_v8 }
 0x77a   :  { %v4815_v9 = vpop.eup %4814 }
 0x77b   :  { %v799_v10 = vsel %vm302_vm4, %v4815_v9, 0.0 }
 0x77c   :  { %800 = vadd.xlane.f32.xlu1 %v799_v10 }
 0x78d   :  { %958 = vrot.lane.b32.xlu1 %v5115_v11, %s4927_s16 }
 0x78e   :  { %806 = vrot.lane.b32.xlu0 %v5115_v11, %s4925_s0 }
 0x792   :  { %1038 = vrot.lane.b32.xlu0 %v5119_v12, %s4926_s2 }
 0x796   :  { %1036 = vrot.lane.b32.xlu0 %v5119_v12, %s4927_s16 }
 0x805   :  { %v798_v13 = vpop.xlane.xlu0 %797 }
 0x806   :  { %4816 = vrcp.f32 %v798_v13 }
 0x809   :  { %v801_v14 = vpop.xlane.xlu1 %800  ;;  %v807_v15 = vpop.permute.xlu0 %806 }
 0x80a   :  { %4818 = vrcp.f32 %v801_v14  ;;  %4361 = vmatpush3.msra.mxu1 %v807_v15 }
 0x80b   :  { %4365 = vmatprep.subr.mxu1 %v4918_v7 }
 0x80d   :  { %v959_v16 = vpop.permute.xlu1 %958  ;;  %v1039_v22 = vpop.permute.xlu0 %1038 }
 0x80e   :  { %4373 = vmatmul.mubr.msk.f32.vlgmr.msra.gmra.mrb[2].mxu0 %vm302_vm4, %v959_v16 }
 0x80f   :  { %4382 = vmatprep.mubr.msk.f32.mxu0 %vm4919_vm3, %v4918_v7 }
 0x810   :  { %v4817_v18 = vpop.eup %4816 }
 0x811   :  { %v804_v19 = vmul.f32 %v4817_v18, %v4813_v6  ;;  %v1037_v23 = vpop.permute.xlu0 %1036 }
 0x813   :  { %4363 = vmatmul.mubr.msk.f32.vlgmr.msra.gmra.mrb[14].mxu1 %vm302_vm4, %v804_v19 }
 0x814   :  { %v4819_v20 = vpop.eup %4818  ;;  %4366 = vmatpush3.msra.mxu1 %v883_v1  ;;  %4367 = vmatprep.mubr.msk.f32.mxu1 %vm4919_vm3, %v4918_v7 }
 0x815   :  { %v805_v21 = vmul.f32 %v4819_v20, %v4815_v9  ;;  %4375 = vmatprep.subr.mxu1 %v4918_v7 }
 0x817   :  { %4368 = vmatmul.mubr.msk.f32.vlgmr.msra.gmra.mrb[16].mxu1 %vm302_vm4, %v805_v21 }
 0x818   :  { %4377 = vmatprep.mubr.msk.f32.mxu1 %vm4919_vm3, %v4918_v7 }
 0x81b   :  { %4376 = vmatpush3.xpose.msk.msra.mxu1 %vm302_vm4, %v1039_v22 }
 0x81c   :  { %4385 = vmatprep.subr.mxu1 %v4918_v7 }
 0x81e   :  { %4378 = vmatmul.mubr.msk.f32.vlgmr.msra.gmra.mrb[18].mxu1 %vm302_vm4, %v1037_v23 }
 0x81f   :  { %4387 = vmatprep.mubr.msk.f32.mxu1 %vm4919_vm3, %v4918_v7 }
 0x8e1   :  { %v1032_v24 = vpop.f32.mrb[2].mxu0 }
 0x8e2   :  { %v1033_v25 = vadd.f32 %v1032_v24, %v5137_v17  ;;  %v4374_v26 = vpop.f32.mrb[3].mxu0 }
 0x8e4   :  { %v1114_v27 = vsel %vm302_vm4, %v1033_v25, -inf }
 0x8e5   :  { %1115 = vmax.xlane.f32.xlu1 %v1114_v27 }
 0x8e6   :  { %v5217_v28 = vpop.f32.mrb[14].mxu1 }
 0x8e7   :  { %v4364_v29 = vpop.f32.mrb[15].mxu1 }
 0x8ea   :  { %v5219_v30 = vpop.f32.mrb[16].mxu1 }
 0x8eb   :  { %v4369_v31 = vpop.f32.mrb[17].mxu1 }
 0x8f1   :  { %v1110_v32 = vpop.f32.mrb[18].mxu1 }
 0x8f2   :  { %v1111_v33 = vadd.f32 %v1110_v32, %v5137_v17  ;;  %v4379_v34 = vpop.f32.mrb[19].mxu1  ;;  %v1652_v32 = vld [vmem:[%s5744_s5 + $0x10] sm:$0xff] }
 0x8f3   :  { %v1653_v34 = vld [vmem:[%s5744_s5 + $0x18] sm:$0xff] }
 0x8f4   :  { %v1117_v37 = vsel %vm302_vm4, %v1111_v33, -inf }
 0x8f5   :  { %1118 = vmax.xlane.f32.xlu0 %v1117_v37  ;;  %v4670_v37 = vpack.c.bf16 %v1653_v34, %v1652_v32  ;;  %v1904_v34 = vld [vmem:[%s5749_s10 + $0x10] sm:$0xff] }
 0x8f6   :  { %1212 = vrot.lane.b32.xlu1 %v5119_v12, %s4928_s17 }
 0x8fa   :  { %1290 = vrot.lane.b32.xlu1 %v5115_v11, %s4929_s18 }
 0x972   :  { %v1116_v38 = vpop.xlane.xlu1 %1115 }
 0x973   :  { %v1120_v39 = vsub.f32 %v1033_v25, %v1116_v38 }
 0x975   :  { %v1122_v40 = vmul.f32 1.442695, %v1120_v39 }
 0x976   :  { %v1213_v41 = vpop.permute.xlu1 %1212 }
 0x977   :  { %4820 = vpow2.f32 %v1122_v40  ;;  %4386 = vmatpush3.msra.mxu1 %v1213_v41 }
 0x978   :  { %4395 = vmatprep.subr.mxu1 %v4918_v7 }
 0x97a   :  { %v1291_v54 = vpop.permute.xlu1 %1290 }
 0x981   :  { %v4821_v42 = vpop.eup %4820 }
 0x982   :  { %v1119_v43 = vpop.xlane.xlu0 %1118  ;;  %v1126_v44 = vsel %vm302_vm4, %v4821_v42, 0.0 }
 0x983   :  { %v1121_v45 = vsub.f32 %v1111_v33, %v1119_v43  ;;  %1127 = vadd.xlane.f32.xlu0 %v1126_v44 }
 0x985   :  { %v1124_v46 = vmul.f32 1.442695, %v1121_v45 }
 0x987   :  { %4822 = vpow2.f32 %v1124_v46 }
 0x991   :  { %v4823_v47 = vpop.eup %4822 }
 0x992   :  { %v1129_v48 = vsel %vm302_vm4, %v4823_v47, 0.0 }
 0x993   :  { %1130 = vadd.xlane.f32.xlu1 %v1129_v48 }
 0x999   :  { %1136 = vrot.lane.b32.xlu0 %v5115_v11, %s4928_s17 }
 0x99d   :  { %1368 = vrot.lane.b32.xlu0 %v5119_v12, %s4929_s18 }
 0x9a1   :  { %1366 = vrot.lane.b32.xlu0 %v5119_v12, %s5762_s19 }
 0x9a4   :  { %1288 = vrot.lane.b32.xlu1 %v5115_v11, %s5762_s19 }
 0xa10   :  { %v1128_v49 = vpop.xlane.xlu0 %1127 }
 0xa11   :  { %4824 = vrcp.f32 %v1128_v49 }
 0xa14   :  { %v1137_v51 = vpop.permute.xlu0 %1136 }
 0xa15   :  { %4381 = vmatpush3.msra.mxu0 %v1137_v51 }
 0xa16   :  { %4390 = vmatprep.subr.mxu0 %v4918_v7 }
 0xa18   :  { %v1369_v59 = vpop.permute.xlu0 %1368 }
 0xa1b   :  { %v4825_v53 = vpop.eup %4824 }
 0xa1c   :  { %v1134_v55 = vmul.f32 %v4825_v53, %v4821_v42  ;;  %v1367_v61 = vpop.permute.xlu0 %1366 }
 0xa1e   :  { %4383 = vmatmul.mubr.msk.f32.vlgmr.msra.gmra.mrb[4].mxu0 %vm302_vm4, %v1134_v55 }
 0xa1f   :  { %4391 = vmatpush3.xpose.msk.msra.mxu0 %vm302_vm4, %v1291_v54  ;;  %4392 = vmatprep.mubr.msk.f32.mxu0 %vm4919_vm3, %v4918_v7 }
 0xa20   :  { %v1131_v56 = vpop.xlane.xlu1 %1130  ;;  %4400 = vmatprep.subr.mxu0 %v4918_v7 }
 0xa21   :  { %4826 = vrcp.f32 %v1131_v56  ;;  %v4036_v56 = vld [vmem:[%s5745_s6] ss:$0 sm:$0xff] }
 0xa24   :  { %v1289_v57 = vpop.permute.xlu1 %1288 }
 0xa25   :  { %4393 = vmatmul.mubr.msk.f32.vlgmr.msra.gmra.mrb[6].mxu0 %vm302_vm4, %v1289_v57 }
 0xa26   :  { %4402 = vmatprep.mubr.msk.f32.mxu0 %vm4919_vm3, %v4918_v7 }
 0xa2b   :  { %v4827_v58 = vpop.eup %4826 }
 0xa2c   :  { %v1135_v60 = vmul.f32 %v4827_v58, %v4823_v47 }
 0xa2e   :  { %4388 = vmatmul.mubr.msk.f32.vlgmr.msra.gmra.mrb[20].mxu1 %vm302_vm4, %v1135_v60 }
 0xa2f   :  { %4396 = vmatpush3.xpose.msk.msra.mxu1 %vm302_vm4, %v1369_v59  ;;  %4397 = vmatprep.mubr.msk.f32.mxu1 %vm4919_vm3, %v4918_v7 }
 0xa30   :  { %4405 = vmatprep.subr.mxu1 %v4918_v7 }
 0xa32   :  { %4398 = vmatmul.mubr.msk.f32.vlgmr.msra.gmra.mrb[22].mxu1 %vm302_vm4, %v1367_v61 }
 0xa33   :  { %4407 = vmatprep.mubr.msk.f32.mxu1 %vm4919_vm3, %v4918_v7 }
 0xaf1   :  { %v1208_v62 = vpop.f32.mrb[4].mxu0 }
 0xaf2   :  { %v4384_v63 = vpop.f32.mrb[5].mxu0 }
 0xaf8   :  { %v1362_v0 = vpop.f32.mrb[6].mxu0 }
 0xaf9   :  { %v1363_v1 = vadd.f32 %v1362_v0, %v5137_v17  ;;  %v4394_v2 = vpop.f32.mrb[7].mxu0 }
 0xafb   :  { %v1444_v3 = vsel %vm302_vm4, %v1363_v1, -inf }
 0xafc   :  { %1445 = vmax.xlane.f32.xlu1 %v1444_v3 }
 0xb01   :  { %v1284_v4 = vpop.f32.mrb[20].mxu1 }
 0xb02   :  { %v4389_v5 = vpop.f32.mrb[21].mxu1 }
 0xb05   :  { %v1440_v6 = vpop.f32.mrb[22].mxu1 }
 0xb06   :  { %v1441_v8 = vadd.f32 %v1440_v6, %v5137_v17  ;;  %v4399_v9 = vpop.f32.mrb[23].mxu1 }
 0xb07   :  { %v1793_v9 = vld [vmem:[%s5747_s8 + $0x8] sm:$0xff] }
 0xb08   :  { %v1447_v10 = vsel %vm302_vm4, %v1441_v8, -inf }
 0xb09   :  { %1448 = vmax.xlane.f32.xlu0 %v1447_v10 }
 0xb89   :  { %v1446_v13 = vpop.xlane.xlu1 %1445 }
 0xb8a   :  { %v1450_v14 = vsub.f32 %v1363_v1, %v1446_v13  ;;  %v1794_v13 = vld [vmem:[%s5747_s8 + $0x10] sm:$0xff] }
 0xb8c   :  { %v1452_v15 = vmul.f32 1.442695, %v1450_v14  ;;  %v1795_v14 = vld [vmem:[%s5747_s8 + $0x18] sm:$0xff] }
 0xb8e   :  { %4828 = vpow2.f32 %v1452_v15  ;;  %v4678_v15 = vpack.c.bf16 %v1795_v14, %v1794_v13 }
 0xb96   :  { %v1449_v16 = vpop.xlane.xlu0 %1448 }
 0xb97   :  { %v1451_v18 = vsub.f32 %v1441_v8, %v1449_v16  ;;  %v1792_v8 = vld [vmem:[%s5747_s8] sm:$0xff] }
 0xb98   :  { %v4829_v19 = vpop.eup %4828  ;;  %v4674_v10 = vpack.c.bf16 %v1793_v9, %v1792_v8  ;;  %v1902_v16 = vld [vmem:[%s5749_s10] sm:$0xff] }
 0xb99   :  { %v1454_v20 = vmul.f32 1.442695, %v1451_v18  ;;  %v1456_v21 = vsel %vm302_vm4, %v4829_v19, 0.0  ;;  %v1903_v18 = vld [vmem:[%s5749_s10 + $0x8] sm:$0xff] }
 0xb9a   :  { %1457 = vadd.xlane.f32.xlu0 %v1456_v21 }
 0xb9b   :  { %4830 = vpow2.f32 %v1454_v20 }
 0xba5   :  { %v4831_v22 = vpop.eup %4830 }
 0xba6   :  { %v1459_v23 = vsel %vm302_vm4, %v4831_v22, 0.0 }
 0xba7   :  { %1460 = vadd.xlane.f32.xlu1 %v1459_v23 }
 0xbb0   :  { %1466 = vrot.lane.b32.xlu0 %v5115_v11, %s5760_s20 }
 0xbb4   :  { %1622 = vrot.lane.b32.xlu0 %v5219_v30, %s5756_s21 }
 0xbb8   :  { %1630 = vrot.lane.b32.xlu0 %v1284_v4, %s5754_s22  ;;  %1542 = vrot.lane.b32.xlu1 %v5119_v12, %s5760_s20  ;;  %v1650_v12 = vld [vmem:[%s5744_s5] sm:$0xff] }
 0xbbc   :  { %1620 = vrot.lane.b32.xlu1 %v5217_v28, %s5756_s21  ;;  %v1651_v28 = vld [vmem:[%s5744_s5 + $0x8] sm:$0xff] }
 0xbbd   :  { %v4666_v33 = vpack.c.bf16 %v1651_v28, %v1650_v12 }
 0xbc0   :  { %1628 = vrot.lane.b32.xlu1 %v1208_v62, %s5754_s22  ;;  %s5768_s22 = smov 24  }
 0xc27   :  { %v1458_v24 = vpop.xlane.xlu0 %1457 }
 0xc28   :  { %4832 = vrcp.f32 %v1458_v24 }
 0xc2b   :  { %v1467_v25 = vpop.permute.xlu0 %1466 }
 0xc2c   :  { %4401 = vmatpush3.msra.mxu0 %v1467_v25 }
 0xc2f   :  { %v1623_v48 = vpop.permute.xlu0 %1622 }
 0xc30   :  { %v1643_v51 = vsel %vm302_vm4, %v5177_v52, %v1623_v48  ;;  %v1912_v48 = vld [vmem:[%s5749_s10 + $0x50] sm:$0xff] }
 0xc32   :  { %v4833_v11 = vpop.eup %4832 }
 0xc33   :  { %v1464_v26 = vmul.f32 %v4833_v11, %v4829_v19  ;;  %v1631_v49 = vpop.permute.xlu0 %1630  ;;  %v4682_v19 = vpack.c.bf16 %v1903_v18, %v1902_v16 }
 0xc34   :  { %v1461_v27 = vpop.xlane.xlu1 %1460  ;;  %v1646_v53 = vsel %vm1644_vm7, %v1643_v51, %v1631_v49  ;;  %v1913_v49 = vld [vmem:[%s5749_s10 + $0x58] sm:$0xff] }
 0xc35   :  { %4834 = vrcp.f32 %v1461_v27  ;;  %4403 = vmatmul.mubr.msk.f32.vlgmr.msra.gmra.mrb[8].mxu0 %vm302_vm4, %v1464_v26  ;;  %4683 = vmatprep.subr.bf16.mxu0 %v4682_v19  ;;  %v4039_v26 = vld [vmem:[%s5746_s7 + $0x2] ss:$0 sm:$0xff]  ;;  %v4702_v51 = vpack.c.bf16 %v1913_v49, %v1912_v48 }
 0xc36   :  { %4685 = vmatpush3.bf16.msra.mxu0 %v4682_v19 }
 0xc38   :  { %v1543_v29 = vpop.permute.xlu1 %1542 }
 0xc39   :  { %4406 = vmatpush3.msra.mxu1 %v1543_v29 }
 0xc3a   :  { %4667 = vmatprep.subr.bf16.mxu1 %v4666_v33 }
 0xc3c   :  { %v1621_v42 = vpop.permute.xlu1 %1620 }
 0xc3d   :  { %v1642_v44 = vsel %vm302_vm4, %v5175_v50, %v1621_v42  ;;  %v1908_v42 = vld [vmem:[%s5749_s10 + $0x30] sm:$0xff] }
 0xc3f   :  { %v4835_v30 = vpop.eup %4834 }
 0xc40   :  { %v1465_v31 = vmul.f32 %v4835_v30, %v4831_v22  ;;  %v1629_v43 = vpop.permute.xlu1 %1628 }
 0xc41   :  { %v1645_v45 = vsel %vm1644_vm7, %v1642_v44, %v1629_v43  ;;  %v1909_v43 = vld [vmem:[%s5749_s10 + $0x38] sm:$0xff] }
 0xc42   :  { %4408 = vmatmul.mubr.msk.f32.vlgmr.msra.gmra.mrb[24].mxu1 %vm302_vm4, %v1465_v31  ;;  %v4040_v31 = vld [vmem:[%s5746_s7 + $0x3] ss:$0 sm:$0xff]  ;;  %v4694_v44 = vpack.c.bf16 %v1909_v43, %v1908_v42 }
 0xc43   :  { %4669 = vmatpush3.bf16.msra.mxu1 %v4666_v33 }
 0xc44   :  { %4671 = vmatprep.subr.bf16.mxu1 %v4670_v37 }
 0xc47   :  { %4673 = vmatpush3.bf16.msra.mxu1 %v4670_v37  ;;  %v1905_v37 = vld [vmem:[%s5749_s10 + $0x18] sm:$0xff] }
 0xc48   :  { %4675 = vmatprep.subr.bf16.mxu1 %v4674_v10 }
 0xd08   :  { %v1538_v38 = vpop.f32.mrb[8].mxu0 }
 0xd09   :  { %1636 = vrot.lane.b32.xlu1 %v1538_v38, %s5758_s23  ;;  %v4404_v39 = vpop.f32.mrb[9].mxu0  ;;  %v4686_v38 = vpack.c.bf16 %v1905_v37, %v1904_v34  ;;  %v4049_v37 = vld [vmem:[%s5742_s3 + $0x20] sm:$0xff] }
 0xd0a   :  { %v1906_v39 = vld [vmem:[%s5749_s10 + $0x20] sm:$0xff] }
 0xd0b   :  { %4687 = vmatprep.subr.bf16.mxu0 %v4686_v38 }
 0xd0c   :  { %4689 = vmatpush3.bf16.msra.mxu0 %v4686_v38  ;;  %v4050_v38 = vld [vmem:[%s5742_s3 + $0x28] sm:$0xff] }
 0xd15   :  { %v1614_v40 = vpop.f32.mrb[24].mxu1 }
 0xd16   :  { %1638 = vrot.lane.b32.xlu0 %v1614_v40, %s5758_s23  ;;  %v4409_v41 = vpop.f32.mrb[25].mxu1  ;;  %v1907_v40 = vld [vmem:[%s5749_s10 + $0x28] sm:$0xff] }
 0xd17   :  { %v4690_v41 = vpack.c.bf16 %v1907_v40, %v1906_v39  ;;  %v4714_v39 = vpack.c.bf16 %v4050_v38, %v4049_v37  ;;  %v4051_v40 = vld [vmem:[%s5742_s3 + $0x30] sm:$0xff] }
 0xd19   :  { %4691 = vmatprep.subr.bf16.mxu0 %v4690_v41 }
 0xd1a   :  { %4693 = vmatpush3.bf16.msra.mxu0 %v4690_v41  ;;  %v4052_v41 = vld [vmem:[%s5742_s3 + $0x38] sm:$0xff] }
 0xd1b   :  { %4695 = vmatprep.subr.bf16.mxu0 %v4694_v44  ;;  %v4718_v42 = vpack.c.bf16 %v4052_v41, %v4051_v40 }
 0xd1e   :  { %4697 = vmatpush3.bf16.msra.mxu0 %v4694_v44 }
 0xd7b   :  { %v1637_v46 = vpop.permute.xlu1 %1636 }
 0xd7c   :  { %v1648_v47 = vsel %vm1647_vm6, %v1645_v45, %v1637_v46  ;;  %v1910_v45 = vld [vmem:[%s5749_s10 + $0x40] sm:$0xff]  ;;  %v1911_v46 = vld [vmem:[%s5749_s10 + $0x48] sm:$0xff] }
 0xd7d   :  { %4418 = vmatprep.mubr.msk.f32.mxu1 %vm163_vm2, %v1648_v47  ;;  %v4698_v47 = vpack.c.bf16 %v1911_v46, %v1910_v45 }
 0xd7f   :  { %4699 = vmatprep.subr.bf16.mxu0 %v4698_v47 }
 0xd80   :  { %4701 = vmatpush3.bf16.msra.mxu0 %v4698_v47 }
 0xd81   :  { %4703 = vmatprep.subr.bf16.mxu0 %v4702_v51 }
 0xd84   :  { %4705 = vmatpush3.bf16.msra.mxu0 %v4702_v51  ;;  %v4047_v51 = vld [vmem:[%s5746_s7 + $0x4] ss:$0 sm:$0xff] }
 0xd88   :  { %v1639_v54 = vpop.permute.xlu0 %1638 }
 0xd89   :  { %v1649_v55 = vsel %vm1647_vm6, %v1646_v53, %v1639_v54  ;;  %v1914_v53 = vld [vmem:[%s5749_s10 + $0x60] sm:$0xff]  ;;  %v1915_v54 = vld [vmem:[%s5749_s10 + $0x68] sm:$0xff] }
 0xd8a   :  { %4419 = vmatmul.mubr.msk.f32.vlgmr.msra.gmra.mrb[26].mxu1 %vm163_vm2, %v1649_v55  ;;  %v4706_v55 = vpack.c.bf16 %v1915_v54, %v1914_v53 }
 0xd8b   :  { %4677 = vmatpush3.bf16.msra.mxu1 %v4674_v10 }
 0xd8c   :  { %4679 = vmatprep.subr.bf16.mxu1 %v4678_v15  ;;  %4707 = vmatprep.subr.bf16.mxu0 %v4706_v55 }
 0xd8d   :  { %4709 = vmatpush3.bf16.msra.mxu0 %v4706_v55 }
 0xd8f   :  { %4681 = vmatpush3.bf16.msra.mxu1 %v4678_v15 }
 0xd90   :  { %4715 = vmatprep.subr.bf16.mxu1 %v4714_v39 }
 0xe5d   :  { %v4420_v50 = vpop.f32.mrb[26].mxu1 }
 0xe5e   :  { %v1736_v57 = vadd.f32 %v4420_v50, %v5076_v36  ;;  %v1726_v58 = vpop.f32.mrb[27].mxu1  ;;  %v1916_v50 = vld [vmem:[%s5749_s10 + $0x70] sm:$0xff] }
 0xe5f   :  { %v1735_v59 = vadd.f32 %v1726_v58, %v5074_v35  ;;  %v4041_v58 = vld [vmem:[%s5748_s9] ss:$0 sm:$0xff] }
 0xe60   :  { %v5302_v60 = vadd.f32 %v4036_v56, %v1736_v57 }
 0xe61   :  { %v5304_v52 = vadd.f32 %v4036_v56, %v1735_v59  ;;  %v1917_v56 = vld [vmem:[%s5749_s10 + $0x78] sm:$0xff] }
 0xe62   :  { %v1753_v61 = vsel %vm163_vm2, %v5302_v60, 0.0  ;;  %v4710_v57 = vpack.c.bf16 %v1917_v56, %v1916_v50  ;;  %v4048_v50 = vld [vmem:[%s5746_s7 + $0x5] ss:$0 sm:$0xff] }
 0xe63   :  { %1754 = vadd.xlane.f32.xlu0 %v1753_v61  ;;  %v1750_v62 = vsel %vm163_vm2, %v5304_v52, 0.0 }
 0xe64   :  { %1751 = vadd.xlane.f32.xlu1 %v1750_v62  ;;  %4711 = vmatprep.subr.bf16.mxu0 %v4710_v57 }
 0xe65   :  { %4713 = vmatpush3.bf16.msra.mxu0 %v4710_v57 }
 0xe66   :  { %4508 = vmatprep.subr.mxu0 %v4918_v7 }
 0xef0   :  { %v1755_v63 = vpop.xlane.xlu0 %1754 }
 0xef1   :  { %v1757_v0 = vmul.f32 0.03125, %v1755_v63  ;;  %v1752_v1 = vpop.xlane.xlu1 %1751 }
 0xef2   :  { %v1756_v2 = vmul.f32 0.03125, %v1752_v1 }
 0xef3   :  { %v1759_v36 = vsub.f32 %v5302_v60, %v1757_v0 }
 0xef4   :  { %v1758_v35 = vsub.f32 %v5304_v52, %v1756_v2 }
 0xef5   :  { %v1761_v3 = vmul.f32 %v1759_v36, %v1759_v36 }
 0xef6   :  { %v1760_v4 = vmul.f32 %v1758_v35, %v1758_v35 }
 0xef7   :  { %v1765_v5 = vsel %vm163_vm2, %v1761_v3, 0.0 }
 0xef8   :  { %1766 = vadd.xlane.f32.xlu1 %v1765_v5  ;;  %v1762_v6 = vsel %vm163_vm2, %v1760_v4, 0.0 }
 0xef9   :  { %1763 = vadd.xlane.f32.xlu0 %v1762_v6 }
 0xf85   :  { %v1767_v20 = vpop.xlane.xlu1 %1766 }
 0xf86   :  { %v1769_v21 = vmul.f32 0.03125, %v1767_v20  ;;  %v1764_v22 = vpop.xlane.xlu0 %1763 }
 0xf87   :  { %v1768_v23 = vmul.f32 0.03125, %v1764_v22 }
 0xf88   :  { %v1771_v24 = vadd.f32 1e-05, %v1769_v21  ;;  %v4044_v21 = vld [vmem:[%s5750_s11] ss:$0 sm:$0xff] }
 0xf89   :  { %v1770_v25 = vadd.f32 1e-05, %v1768_v23 }
 0xf8a   :  { %4836 = vrsqrt.f32 %v1771_v24 }
 0xf8b   :  { %4838 = vrsqrt.f32 %v1770_v25 }
 0xf94   :  { %v4837_v11 = vpop.eup %4836 }
 0xf95   :  { %v4839_v27 = vpop.eup %4838  ;;  %v1775_v29 = vmul.f32 %v4837_v11, %v1759_v36 }
 0xf96   :  { %v1774_v30 = vmul.f32 %v4839_v27, %v1758_v35 }
 0xf97   :  { %v1783_v12 = vmul.f32 %v4039_v26, %v1775_v29 }
 0xf98   :  { %v1782_v28 = vmul.f32 %v4039_v26, %v1774_v30 }
 0xf99   :  { %v1791_v33 = vadd.f32 %v4040_v31, %v1783_v12 }
 0xf9a   :  { %v1790_v32 = vadd.f32 %v4040_v31, %v1782_v28 }
 0xf9c   :  { %4429 = vmatprep.mubr.msk.f32.mxu1 %vm163_vm2, %v1790_v32 }
 0xf9d   :  { %4430 = vmatmul.mubr.msk.f32.vlgmr.msra.gmra.mrb[28].mxu1 %vm163_vm2, %v1791_v33 }
 0xf9e   :  { %4717 = vmatpush3.bf16.msra.mxu1 %v4714_v39 }
 0xf9f   :  { %4719 = vmatprep.subr.bf16.mxu1 %v4718_v42 }
 0xfa2   :  { %4721 = vmatpush3.bf16.msra.mxu1 %v4718_v42 }
 0xfa3   :  { %4478 = vmatprep.subr.mxu1 %v4918_v7 }
0x1070   :  { %v4431_v59 = vpop.f32.mrb[28].mxu1 }
0x1071   :  { %v1881_v61 = vadd.f32 %v4431_v59, %v4041_v58  ;;  %v1875_v62 = vpop.f32.mrb[29].mxu1 }
0x1072   :  { %v1876_v63 = vadd.f32 %v4041_v58, %v1875_v62 }
0x1073   :  { %v1887_v0 = vmul.f32 0.044715, %v1881_v61  ;;  %v1885_v16 = vmul.f32 0.5, %v1881_v61 }
0x1074   :  { %v1886_v1 = vmul.f32 0.044715, %v1876_v63  ;;  %v1884_v14 = vmul.f32 0.5, %v1876_v63 }
0x1075   :  { %v1889_v2 = vmul.f32 %v1887_v0, %v1881_v61 }
0x1076   :  { %v1888_v36 = vmul.f32 %v1886_v1, %v1876_v63 }
0x1077   :  { %v1891_v35 = vmul.f32 %v1889_v2, %v1881_v61 }
0x1078   :  { %v1890_v3 = vmul.f32 %v1888_v36, %v1876_v63 }
0x1079   :  { %v1893_v4 = vadd.f32 %v1891_v35, %v1881_v61  ;;  %v4054_v61 = vld [vmem:[%s5743_s4 + $0x1] ss:$0 sm:$0xff]  ;;  %s5764_s4 = smov 104  }
0x107a   :  { %v1892_v5 = vadd.f32 %v1890_v3, %v1876_v63 }
0x107b   :  { %v1895_v6 = vmul.f32 0.7978846, %v1893_v4 }
0x107c   :  { %v1894_v8 = vmul.f32 0.7978846, %v1892_v5 }
0x107d   :  { %4840 = vtanh.f32 %v1895_v6 }
0x107e   :  { %4842 = vtanh.f32 %v1894_v8 }
0x1087   :  { %v4841_v9 = vpop.eup %4840 }
0x1088   :  { %v4843_v10 = vpop.eup %4842  ;;  %v1899_v13 = vadd.f32 1.0, %v4841_v9 }
0x1089   :  { %v1898_v15 = vadd.f32 1.0, %v4843_v10 }
0x108a   :  { %v1901_v19 = vmul.f32 %v1899_v13, %v1885_v16 }
0x108b   :  { %v1900_v18 = vmul.f32 %v1898_v15, %v1884_v14 }
0x108d   :  { %4464 = vmatprep.mubr.f32.mxu0 %v1900_v18 }
0x108e   :  { %4465 = vmatmul.mubr.f32.vlgmr.msra.gmra.mrb[10].mxu0 %v1901_v19 }
0x108f   :  { %4510 = vmatprep.mubr.msk.f32.mxu0 %vm4919_vm3, %v4918_v7 }
0x1161   :  { %v4466_v20 = vpop.f32.mrb[10].mxu0 }
0x1162   :  { %v1994_v22 = vadd.f32 %v4466_v20, %v5302_v60  ;;  %v1984_v23 = vpop.f32.mrb[11].mxu0 }
0x1163   :  { %v1993_v24 = vadd.f32 %v1984_v23, %v5304_v52 }
0x1164   :  { %v5393_v25 = vadd.f32 %v4044_v21, %v1994_v22 }
0x1165   :  { %v5395_v11 = vadd.f32 %v4044_v21, %v1993_v24 }
0x1166   :  { %v2011_v26 = vsel %vm163_vm2, %v5393_v25, 0.0 }
0x1167   :  { %2012 = vadd.xlane.f32.xlu1 %v2011_v26  ;;  %v2008_v27 = vsel %vm163_vm2, %v5395_v11, 0.0 }
0x1168   :  { %2009 = vadd.xlane.f32.xlu0 %v2008_v27 }
0x11f4   :  { %v2013_v29 = vpop.xlane.xlu1 %2012 }
0x11f5   :  { %v2015_v30 = vmul.f32 0.03125, %v2013_v29  ;;  %v2010_v31 = vpop.xlane.xlu0 %2009 }
0x11f6   :  { %v2014_v12 = vmul.f32 0.03125, %v2010_v31 }
0x11f7   :  { %v2017_v60 = vsub.f32 %v5393_v25, %v2015_v30 }
0x11f8   :  { %v2016_v52 = vsub.f32 %v5395_v11, %v2014_v12 }
0x11f9   :  { %v2019_v28 = vmul.f32 %v2017_v60, %v2017_v60 }
0x11fa   :  { %v2018_v32 = vmul.f32 %v2016_v52, %v2016_v52 }
0x11fb   :  { %v2023_v33 = vsel %vm163_vm2, %v2019_v28, 0.0 }
0x11fc   :  { %2024 = vadd.xlane.f32.xlu1 %v2023_v33  ;;  %v2020_v34 = vsel %vm163_vm2, %v2018_v32, 0.0 }
0x11fd   :  { %2021 = vadd.xlane.f32.xlu0 %v2020_v34 }
0x1289   :  { %v2025_v43 = vpop.xlane.xlu1 %2024 }
0x128a   :  { %v2027_v44 = vmul.f32 0.03125, %v2025_v43  ;;  %v2022_v45 = vpop.xlane.xlu0 %2021 }
0x128b   :  { %v2026_v46 = vmul.f32 0.03125, %v2022_v45 }
0x128c   :  { %v2029_v47 = vadd.f32 1e-05, %v2027_v44 }
0x128d   :  { %v2028_v48 = vadd.f32 1e-05, %v2026_v46 }
0x128e   :  { %4844 = vrsqrt.f32 %v2029_v47 }
0x128f   :  { %4846 = vrsqrt.f32 %v2028_v48 }
0x1298   :  { %v4845_v49 = vpop.eup %4844 }
0x1299   :  { %v4847_v53 = vpop.eup %4846  ;;  %v2033_v54 = vmul.f32 %v4845_v49, %v2017_v60 }
0x129a   :  { %v2032_v55 = vmul.f32 %v4847_v53, %v2016_v52 }
0x129b   :  { %v2041_v56 = vmul.f32 %v4047_v51, %v2033_v54 }
0x129c   :  { %v2040_v57 = vmul.f32 %v4047_v51, %v2032_v55 }
0x129d   :  { %v2049_v59 = vadd.f32 %v4048_v50, %v2041_v56 }
0x129e   :  { %v2048_v58 = vadd.f32 %v4048_v50, %v2040_v57 }
0x12a0   :  { %4475 = vmatprep.mubr.msk.f32.mxu1 %vm163_vm2, %v2048_v58 }
0x12a1   :  { %4476 = vmatmul.mubr.msk.f32.vlgmr.msra.gmra.mrb[30].mxu1 %vm163_vm2, %v2049_v59 }
0x12a2   :  { %4480 = vmatprep.mubr.msk.f32.mxu1 %vm4919_vm3, %v4918_v7 }
0x1374   :  { %v4477_v62 = vpop.f32.mrb[30].mxu1 }
0x1375   :  { %v5431_v63 = vadd.f32 %v4477_v62, %v4054_v61  ;;  %v2135_v0 = vpop.f32.mrb[31].mxu1 }
0x1376   :  { %v5433_v1 = vadd.f32 %v4054_v61, %v2135_v0 }
0x1377   :  { %2222 = vrot.lane.b32.xlu1 %v5431_v63, %s4920_s29 }
0x1378   :  { %2145 = vrot.lane.b32.xlu0 %v5433_v1, %s4920_s29  ;;  %s5765_s29 = smov 40  }
0x13e9   :  { %v2223_v36 = vpop.permute.xlu1 %2222 }
0x13ea   :  { %v2146_v2 = vpop.permute.xlu0 %2145 }
0x13eb   :  { %4479 = vmatpush3.xpose.msk.msra.mxu1 %vm302_vm4, %v2146_v2 }
0x13ec   :  { %4483 = vmatprep.subr.mxu1 %v4918_v7 }
0x13ee   :  { %4481 = vmatmul.mubr.msk.f32.vlgmr.msra.gmra.mrb[32].mxu1 %vm302_vm4, %v5433_v1 }
0x13ef   :  { %4484 = vmatpush3.xpose.msk.msra.mxu1 %vm302_vm4, %v2223_v36  ;;  %4485 = vmatprep.mubr.msk.f32.mxu1 %vm4919_vm3, %v4918_v7 }
0x13f0   :  { %4488 = vmatprep.subr.mxu1 %v4918_v7 }
0x13f2   :  { %4486 = vmatmul.mubr.msk.f32.vlgmr.msra.gmra.mrb[34].mxu1 %vm302_vm4, %v5431_v63 }
0x13f3   :  { %4490 = vmatprep.mubr.msk.f32.mxu1 %vm4919_vm3, %v4918_v7 }
0x14c1   :  { %v2217_v35 = vpop.f32.mrb[32].mxu1 }
0x14c2   :  { %v2218_v3 = vadd.f32 %v2217_v35, %v5137_v17  ;;  %v4482_v4 = vpop.f32.mrb[33].mxu1 }
0x14c4   :  { %v2298_v5 = vsel %vm302_vm4, %v2218_v3, -inf }
0x14c5   :  { %2299 = vmax.xlane.f32.xlu1 %v2298_v5  ;;  %v2294_v6 = vpop.f32.mrb[34].mxu1 }
0x14c6   :  { %v2295_v8 = vadd.f32 %v2294_v6, %v5137_v17  ;;  %v4487_v9 = vpop.f32.mrb[35].mxu1 }
0x14c8   :  { %v2301_v10 = vsel %vm302_vm4, %v2295_v8, -inf }
0x14c9   :  { %2302 = vmax.xlane.f32.xlu0 %v2301_v10 }
0x14d6   :  { %2396 = vrot.lane.b32.xlu1 %v5431_v63, %s4922_s30 }
0x14da   :  { %2474 = vrot.lane.b32.xlu1 %v5433_v1, %s4923_s15 }
0x1552   :  { %v2300_v13 = vpop.xlane.xlu1 %2299 }
0x1553   :  { %v2304_v14 = vsub.f32 %v2218_v3, %v2300_v13 }
0x1555   :  { %v2306_v15 = vmul.f32 1.442695, %v2304_v14 }
0x1556   :  { %v2303_v16 = vpop.xlane.xlu0 %2302  ;;  %v2397_v24 = vpop.permute.xlu1 %2396 }
0x1557   :  { %4848 = vpow2.f32 %v2306_v15  ;;  %v2305_v18 = vsub.f32 %v2295_v8, %v2303_v16 }
0x1559   :  { %v2308_v19 = vmul.f32 1.442695, %v2305_v18 }
0x155a   :  { %v2475_v26 = vpop.permute.xlu1 %2474 }
0x155b   :  { %4850 = vpow2.f32 %v2308_v19 }
0x1561   :  { %v4849_v20 = vpop.eup %4848 }
0x1562   :  { %v2310_v21 = vsel %vm302_vm4, %v4849_v20, 0.0 }
0x1563   :  { %2311 = vadd.xlane.f32.xlu0 %v2310_v21 }
0x1565   :  { %v4851_v22 = vpop.eup %4850 }
0x1566   :  { %v2313_v23 = vsel %vm302_vm4, %v4851_v22, 0.0 }
0x1567   :  { %2314 = vadd.xlane.f32.xlu1 %v2313_v23 }
0x1578   :  { %2552 = vrot.lane.b32.xlu1 %v5431_v63, %s4923_s15  ;;  %s5767_s15 = smov 16  }
0x1579   :  { %2320 = vrot.lane.b32.xlu0 %v5433_v1, %s4922_s30  ;;  %s5766_s30 = smov 8  }
0x157d   :  { %2472 = vrot.lane.b32.xlu0 %v5433_v1, %s4924_s1 }
0x1581   :  { %2550 = vrot.lane.b32.xlu0 %v5431_v63, %s4924_s1 }
0x15f0   :  { %v2312_v27 = vpop.xlane.xlu0 %2311 }
0x15f1   :  { %4852 = vrcp.f32 %v2312_v27 }
0x15f4   :  { %v2315_v29 = vpop.xlane.xlu1 %2314  ;;  %v2321_v30 = vpop.permute.xlu0 %2320 }
0x15f5   :  { %4854 = vrcp.f32 %v2315_v29  ;;  %4489 = vmatpush3.msra.mxu1 %v2321_v30 }
0x15f6   :  { %4493 = vmatprep.subr.mxu1 %v4918_v7 }
0x15f8   :  { %v2473_v28 = vpop.permute.xlu0 %2472  ;;  %v2553_v32 = vpop.permute.xlu1 %2552 }
0x15fb   :  { %v4853_v31 = vpop.eup %4852 }
0x15fc   :  { %v2318_v12 = vmul.f32 %v4853_v31, %v4849_v20  ;;  %v2551_v33 = vpop.permute.xlu0 %2550 }
0x15fe   :  { %4491 = vmatmul.mubr.msk.f32.vlgmr.msra.gmra.mrb[36].mxu1 %vm302_vm4, %v2318_v12 }
0x15ff   :  { %v4855_v60 = vpop.eup %4854  ;;  %4494 = vmatpush3.msra.mxu1 %v2397_v24  ;;  %4495 = vmatprep.mubr.msk.f32.mxu1 %vm4919_vm3, %v4918_v7 }
0x1600   :  { %v2319_v52 = vmul.f32 %v4855_v60, %v4851_v22  ;;  %4498 = vmatprep.subr.mxu1 %v4918_v7 }
0x1602   :  { %4496 = vmatmul.mubr.msk.f32.vlgmr.msra.gmra.mrb[38].mxu1 %vm302_vm4, %v2319_v52 }
0x1603   :  { %4500 = vmatprep.mubr.msk.f32.mxu1 %vm4919_vm3, %v4918_v7 }
0x1606   :  { %4499 = vmatpush3.xpose.msk.msra.mxu1 %vm302_vm4, %v2475_v26 }
0x1607   :  { %4503 = vmatprep.subr.mxu1 %v4918_v7 }
0x1609   :  { %4501 = vmatmul.mubr.msk.f32.vlgmr.msra.gmra.mrb[40].mxu1 %vm302_vm4, %v2473_v28 }
0x160a   :  { %4504 = vmatpush3.xpose.msk.msra.mxu1 %vm302_vm4, %v2553_v32  ;;  %4505 = vmatprep.mubr.msk.f32.mxu1 %vm4919_vm3, %v4918_v7 }
0x160b   :  { %4513 = vmatprep.subr.mxu1 %v4918_v7 }
0x160d   :  { %4506 = vmatmul.mubr.msk.f32.vlgmr.msra.gmra.mrb[42].mxu1 %vm302_vm4, %v2551_v33 }
0x160e   :  { %4515 = vmatprep.mubr.msk.f32.mxu1 %vm4919_vm3, %v4918_v7 }
0x16d1   :  { %v5487_v34 = vpop.f32.mrb[36].mxu1 }
0x16d2   :  { %v4492_v37 = vpop.f32.mrb[37].mxu1 }
0x16d5   :  { %v5489_v38 = vpop.f32.mrb[38].mxu1 }
0x16d6   :  { %v4497_v39 = vpop.f32.mrb[39].mxu1 }
0x16dc   :  { %v2546_v40 = vpop.f32.mrb[40].mxu1 }
0x16dd   :  { %v2547_v41 = vadd.f32 %v2546_v40, %v5137_v17  ;;  %v4502_v42 = vpop.f32.mrb[41].mxu1 }
0x16df   :  { %v2628_v43 = vsel %vm302_vm4, %v2547_v41, -inf }
0x16e0   :  { %2629 = vmax.xlane.f32.xlu1 %v2628_v43  ;;  %v2624_v44 = vpop.f32.mrb[42].mxu1 }
0x16e1   :  { %v2625_v45 = vadd.f32 %v2624_v44, %v5137_v17  ;;  %v4507_v46 = vpop.f32.mrb[43].mxu1 }
0x16e3   :  { %v2631_v47 = vsel %vm302_vm4, %v2625_v45, -inf }
0x16e4   :  { %2632 = vmax.xlane.f32.xlu0 %v2631_v47 }
0x16f1   :  { %2726 = vrot.lane.b32.xlu1 %v5431_v63, %s4925_s0 }
0x16f5   :  { %2804 = vrot.lane.b32.xlu1 %v5433_v1, %s4926_s2 }
0x16fa   :  { %2650 = vrot.lane.b32.xlu0 %v5433_v1, %s4925_s0 }
0x176d   :  { %v2630_v48 = vpop.xlane.xlu1 %2629 }
0x176e   :  { %v2634_v49 = vsub.f32 %v2547_v41, %v2630_v48 }
0x1770   :  { %v2636_v51 = vmul.f32 1.442695, %v2634_v49 }
0x1771   :  { %v2727_v53 = vpop.permute.xlu1 %2726  ;;  %v2633_v54 = vpop.xlane.xlu0 %2632 }
0x1772   :  { %4856 = vpow2.f32 %v2636_v51  ;;  %v2635_v55 = vsub.f32 %v2625_v45, %v2633_v54  ;;  %4514 = vmatpush3.msra.mxu1 %v2727_v53 }
0x1773   :  { %4523 = vmatprep.subr.mxu1 %v4918_v7 }
0x1774   :  { %v2638_v50 = vmul.f32 1.442695, %v2635_v55 }
0x1775   :  { %v2651_v56 = vpop.permute.xlu0 %2650  ;;  %v2805_v62 = vpop.permute.xlu1 %2804 }
0x1776   :  { %4858 = vpow2.f32 %v2638_v50  ;;  %4509 = vmatpush3.msra.mxu0 %v2651_v56 }
0x1777   :  { %4518 = vmatprep.subr.mxu0 %v4918_v7 }
0x177c   :  { %v4857_v57 = vpop.eup %4856 }
0x177d   :  { %v2640_v58 = vsel %vm302_vm4, %v4857_v57, 0.0 }
0x177e   :  { %2641 = vadd.xlane.f32.xlu0 %v2640_v58 }
0x1780   :  { %v4859_v59 = vpop.eup %4858 }
0x1781   :  { %v2643_v61 = vsel %vm302_vm4, %v4859_v59, 0.0 }
0x1782   :  { %2644 = vadd.xlane.f32.xlu1 %v2643_v61 }
0x1793   :  { %2802 = vrot.lane.b32.xlu1 %v5433_v1, %s4927_s16 }
0x1794   :  { %2882 = vrot.lane.b32.xlu0 %v5431_v63, %s4926_s2 }
0x1798   :  { %2880 = vrot.lane.b32.xlu0 %v5431_v63, %s4927_s16 }
0x180b   :  { %v2642_v0 = vpop.xlane.xlu0 %2641 }
0x180c   :  { %4860 = vrcp.f32 %v2642_v0 }
0x180f   :  { %v2645_v2 = vpop.xlane.xlu1 %2644  ;;  %v2883_v4 = vpop.permute.xlu0 %2882 }
0x1810   :  { %4862 = vrcp.f32 %v2645_v2 }
0x1813   :  { %v2803_v6 = vpop.permute.xlu1 %2802  ;;  %v2881_v8 = vpop.permute.xlu0 %2880 }
0x1816   :  { %v4861_v36 = vpop.eup %4860 }
0x1817   :  { %v2648_v35 = vmul.f32 %v4861_v36, %v4857_v57 }
0x1819   :  { %4511 = vmatmul.mubr.msk.f32.vlgmr.msra.gmra.mrb[12].mxu0 %vm302_vm4, %v2648_v35 }
0x181a   :  { %v4863_v3 = vpop.eup %4862  ;;  %4519 = vmatpush3.xpose.msk.msra.mxu0 %vm302_vm4, %v2805_v62  ;;  %4520 = vmatprep.mubr.msk.f32.mxu0 %vm4919_vm3, %v4918_v7 }
0x181b   :  { %v2649_v5 = vmul.f32 %v4863_v3, %v4859_v59  ;;  %4528 = vmatprep.subr.mxu0 %v4918_v7 }
0x181d   :  { %4516 = vmatmul.mubr.msk.f32.vlgmr.msra.gmra.mrb[44].mxu1 %vm302_vm4, %v2649_v5  ;;  %4521 = vmatmul.mubr.msk.f32.vlgmr.msra.gmra.mrb[14].mxu0 %vm302_vm4, %v2803_v6 }
0x181e   :  { %4524 = vmatpush3.xpose.msk.msra.mxu1 %vm302_vm4, %v2883_v4  ;;  %4525 = vmatprep.mubr.msk.f32.mxu1 %vm4919_vm3, %v4918_v7 }
0x181f   :  { %4533 = vmatprep.subr.mxu1 %v4918_v7  ;;  %4530 = vmatprep.mubr.msk.f32.mxu0 %vm4919_vm3, %v4918_v7 }
0x1821   :  { %4526 = vmatmul.mubr.msk.f32.vlgmr.msra.gmra.mrb[46].mxu1 %vm302_vm4, %v2881_v8 }
0x1822   :  { %4535 = vmatprep.mubr.msk.f32.mxu1 %vm4919_vm3, %v4918_v7 }
0x18ec   :  { %v5527_v9 = vpop.f32.mrb[12].mxu0 }
0x18ed   :  { %v4512_v10 = vpop.f32.mrb[13].mxu0 }
0x18f0   :  { %v5529_v13 = vpop.f32.mrb[44].mxu1  ;;  %v2876_v14 = vpop.f32.mrb[14].mxu0 }
0x18f1   :  { %v2877_v15 = vadd.f32 %v2876_v14, %v5137_v17  ;;  %v4517_v16 = vpop.f32.mrb[45].mxu1  ;;  %v4522_v18 = vpop.f32.mrb[15].mxu0 }
0x18f2   :  { %v4082_v16 = vld [vmem:[%s5744_s5 + $0x28] sm:$0xff] }
0x18f3   :  { %v2958_v19 = vsel %vm302_vm4, %v2877_v15, -inf }
0x18f4   :  { %2959 = vmax.xlane.f32.xlu1 %v2958_v19  ;;  %v2954_v20 = vpop.f32.mrb[46].mxu1  ;;  %v4083_v19 = vld [vmem:[%s5744_s5 + $0x30] sm:$0xff] }
0x18f5   :  { %v2955_v21 = vadd.f32 %v2954_v20, %v5137_v17  ;;  %v4527_v22 = vpop.f32.mrb[47].mxu1  ;;  %v4084_v20 = vld [vmem:[%s5744_s5 + $0x38] sm:$0xff] }
0x18f7   :  { %v2961_v23 = vsel %vm302_vm4, %v2955_v21, -inf }
0x18f8   :  { %2962 = vmax.xlane.f32.xlu0 %v2961_v23 }
0x1905   :  { %3056 = vrot.lane.b32.xlu1 %v5431_v63, %s4928_s17 }
0x1909   :  { %3134 = vrot.lane.b32.xlu1 %v5433_v1, %s4929_s18 }
0x190e   :  { %2980 = vrot.lane.b32.xlu0 %v5433_v1, %s4928_s17 }
0x1981   :  { %v2960_v24 = vpop.xlane.xlu1 %2959 }
0x1982   :  { %v2964_v26 = vsub.f32 %v2877_v15, %v2960_v24 }
0x1984   :  { %v2966_v27 = vmul.f32 1.442695, %v2964_v26 }
0x1985   :  { %v3057_v29 = vpop.permute.xlu1 %3056  ;;  %v2963_v30 = vpop.xlane.xlu0 %2962 }
0x1986   :  { %4864 = vpow2.f32 %v2966_v27  ;;  %v2965_v31 = vsub.f32 %v2955_v21, %v2963_v30  ;;  %4534 = vmatpush3.msra.mxu1 %v3057_v29  ;;  %v4726_v21 = vpack.c.bf16 %v4084_v20, %v4083_v19  ;;  %v4104_v19 = vld [vmem:[%s5749_s10 + $0x98] sm:$0xff] }
0x1987   :  { %4543 = vmatprep.subr.mxu1 %v4918_v7 }
0x1988   :  { %v2968_v12 = vmul.f32 1.442695, %v2965_v31 }
0x1989   :  { %v2981_v60 = vpop.permute.xlu0 %2980  ;;  %v3135_v37 = vpop.permute.xlu1 %3134 }
0x198a   :  { %4866 = vpow2.f32 %v2968_v12  ;;  %4529 = vmatpush3.msra.mxu0 %v2981_v60 }
0x198b   :  { %4538 = vmatprep.subr.mxu0 %v4918_v7 }
0x1990   :  { %v4865_v52 = vpop.eup %4864 }
0x1991   :  { %v2970_v28 = vsel %vm302_vm4, %v4865_v52, 0.0 }
0x1992   :  { %2971 = vadd.xlane.f32.xlu0 %v2970_v28 }
0x1994   :  { %v4867_v32 = vpop.eup %4866 }
0x1995   :  { %v2973_v33 = vsel %vm302_vm4, %v4867_v32, 0.0 }
0x1996   :  { %2974 = vadd.xlane.f32.xlu1 %v2973_v33 }
0x19a7   :  { %3132 = vrot.lane.b32.xlu1 %v5433_v1, %s5764_s4 }
0x19a8   :  { %3212 = vrot.lane.b32.xlu0 %v5431_v63, %s4929_s18 }
0x19ac   :  { %3210 = vrot.lane.b32.xlu0 %v5431_v63, %s5764_s4  ;;  %s4935_s4 = smov [#allocation2]  }
0x1a1f   :  { %v2972_v39 = vpop.xlane.xlu0 %2971 }
0x1a20   :  { %4868 = vrcp.f32 %v2972_v39 }
0x1a23   :  { %v2975_v40 = vpop.xlane.xlu1 %2974  ;;  %v3213_v44 = vpop.permute.xlu0 %3212 }
0x1a24   :  { %4870 = vrcp.f32 %v2975_v40 }
0x1a27   :  { %v3133_v46 = vpop.permute.xlu1 %3132  ;;  %v3211_v47 = vpop.permute.xlu0 %3210 }
0x1a2a   :  { %v4869_v41 = vpop.eup %4868 }
0x1a2b   :  { %v2978_v42 = vmul.f32 %v4869_v41, %v4865_v52 }
0x1a2d   :  { %4531 = vmatmul.mubr.msk.f32.vlgmr.msra.gmra.mrb[16].mxu0 %vm302_vm4, %v2978_v42 }
0x1a2e   :  { %v4871_v43 = vpop.eup %4870  ;;  %4539 = vmatpush3.xpose.msk.msra.mxu0 %vm302_vm4, %v3135_v37  ;;  %4540 = vmatprep.mubr.msk.f32.mxu0 %vm4919_vm3, %v4918_v7 }
0x1a2f   :  { %v2979_v45 = vmul.f32 %v4871_v43, %v4867_v32  ;;  %4548 = vmatprep.subr.mxu0 %v4918_v7 }
0x1a31   :  { %4536 = vmatmul.mubr.msk.f32.vlgmr.msra.gmra.mrb[48].mxu1 %vm302_vm4, %v2979_v45  ;;  %4541 = vmatmul.mubr.msk.f32.vlgmr.msra.gmra.mrb[18].mxu0 %vm302_vm4, %v3133_v46 }
0x1a32   :  { %4544 = vmatpush3.xpose.msk.msra.mxu1 %vm302_vm4, %v3213_v44  ;;  %4545 = vmatprep.mubr.msk.f32.mxu1 %vm4919_vm3, %v4918_v7 }
0x1a33   :  { %4553 = vmatprep.subr.mxu1 %v4918_v7  ;;  %4550 = vmatprep.mubr.msk.f32.mxu0 %vm4919_vm3, %v4918_v7 }
0x1a35   :  { %4546 = vmatmul.mubr.msk.f32.vlgmr.msra.gmra.mrb[50].mxu1 %vm302_vm4, %v3211_v47 }
0x1a36   :  { %4555 = vmatprep.mubr.msk.f32.mxu1 %vm4919_vm3, %v4918_v7 }
0x1b00   :  { %v3052_v48 = vpop.f32.mrb[16].mxu0 }
0x1b01   :  { %v4532_v49 = vpop.f32.mrb[17].mxu0 }
0x1b04   :  { %v3128_v51 = vpop.f32.mrb[48].mxu1  ;;  %v3206_v53 = vpop.f32.mrb[18].mxu0 }
0x1b05   :  { %v3207_v54 = vadd.f32 %v3206_v53, %v5137_v17  ;;  %v4537_v55 = vpop.f32.mrb[49].mxu1  ;;  %v4542_v50 = vpop.f32.mrb[19].mxu0 }
0x1b07   :  { %v3288_v56 = vsel %vm302_vm4, %v3207_v54, -inf }
0x1b08   :  { %3289 = vmax.xlane.f32.xlu1 %v3288_v56  ;;  %v3284_v57 = vpop.f32.mrb[50].mxu1  ;;  %v4093_v56 = vld [vmem:[%s5747_s8 + $0x20] sm:$0xff] }
0x1b09   :  { %v3285_v58 = vadd.f32 %v3284_v57, %v5137_v17  ;;  %v4547_v59 = vpop.f32.mrb[51].mxu1  ;;  %v4094_v57 = vld [vmem:[%s5747_s8 + $0x28] sm:$0xff] }
0x1b0a   :  { %v4095_v59 = vld [vmem:[%s5747_s8 + $0x30] sm:$0xff] }
0x1b0b   :  { %v3291_v61 = vsel %vm302_vm4, %v3285_v58, -inf }
0x1b0c   :  { %3292 = vmax.xlane.f32.xlu0 %v3291_v61  ;;  %v4096_v61 = vld [vmem:[%s5747_s8 + $0x38] sm:$0xff] }
0x1b95   :  { %v3290_v62 = vpop.xlane.xlu1 %3289 }
0x1b96   :  { %v3294_v7 = vsub.f32 %v3207_v54, %v3290_v62  ;;  %v4734_v62 = vpack.c.bf16 %v4096_v61, %v4095_v59 }
0x1b98   :  { %v3296_v0 = vmul.f32 1.442695, %v3294_v7  ;;  %v4101_v7 = vld [vmem:[%s5749_s10 + $0x80] sm:$0xff] }
0x1b99   :  { %v3293_v2 = vpop.xlane.xlu0 %3292 }
0x1b9a   :  { %4872 = vpow2.f32 %v3296_v0  ;;  %v3295_v36 = vsub.f32 %v3285_v58, %v3293_v2  ;;  %v4730_v58 = vpack.c.bf16 %v4094_v57, %v4093_v56  ;;  %v4102_v0 = vld [vmem:[%s5749_s10 + $0x88] sm:$0xff] }
0x1b9b   :  { %v4738_v2 = vpack.c.bf16 %v4102_v0, %v4101_v7 }
0x1b9c   :  { %v3298_v35 = vmul.f32 1.442695, %v3295_v36 }
0x1b9e   :  { %4874 = vpow2.f32 %v3298_v35 }
0x1ba4   :  { %v4873_v3 = vpop.eup %4872 }
0x1ba5   :  { %v3300_v4 = vsel %vm302_vm4, %v4873_v3, 0.0 }
0x1ba6   :  { %3301 = vadd.xlane.f32.xlu0 %v3300_v4 }
0x1ba8   :  { %v4875_v5 = vpop.eup %4874 }
0x1ba9   :  { %v3303_v6 = vsel %vm302_vm4, %v4875_v5, 0.0 }
0x1baa   :  { %3304 = vadd.xlane.f32.xlu1 %v3303_v6 }
0x1bbb   :  { %3386 = vrot.lane.b32.xlu1 %v5431_v63, %s5765_s29 }
0x1bbc   :  { %3310 = vrot.lane.b32.xlu0 %v5433_v1, %s5765_s29  ;;  %s3989_s29 = sshll.u32 %s4935_s4, 4  ;;  %s3990_s29 = int_to_ptr.vmem [resolvable:$true] %s3989_s29 }
0x1bbd   :  { %p4897_p1 = scmp.lt.s32.totalorder %s3990_s29, %s3990_s29 }
0x1bbf   :  { %3464 = vrot.lane.b32.xlu1 %v5527_v9, %s5766_s30 }
0x1bc0   :  { %3466 = vrot.lane.b32.xlu0 %v5529_v13, %s5766_s30  ;;  %v4081_v13 = vld [vmem:[%s5744_s5 + $0x20] sm:$0xff] }
0x1bc1   :  { %v4722_v18 = vpack.c.bf16 %v4082_v16, %v4081_v13 }
0x1bc3   :  { %3472 = vrot.lane.b32.xlu1 %v3052_v48, %s5767_s15 }
0x1bc4   :  { %3474 = vrot.lane.b32.xlu0 %v3128_v51, %s5767_s15  ;;  %s4892_s15 = scalar_lea.vmem %s3990_s29, 256 }
0x1bc5   :  { %p4893_p0 = scmp.ne.s32.totalorder %s3990_s29, %s4892_s15  ;;  %p4898_p2 = scmp.lt.s32.totalorder %s4892_s15, %s4892_s15 }
0x1bc7   :  { %p4899_p3 = por %p4898_p2, %p4897_p1 }
0x1bc9   :  { %p4900_p4 = pnand %p4899_p3, %p4893_p0 }
0x1c33   :  { %v3302_v17 = vpop.xlane.xlu0 %3301 }
0x1c34   :  { %4876 = vrcp.f32 %v3302_v17 }
0x1c37   :  { %v3305_v8 = vpop.xlane.xlu1 %3304  ;;  %v3311_v10 = vpop.permute.xlu0 %3310 }
0x1c38   :  { %4878 = vrcp.f32 %v3305_v8  ;;  %4549 = vmatpush3.msra.mxu0 %v3311_v10  ;;  %v4091_v8 = vld [vmem:[%s5746_s7 + $0x6] ss:$0 sm:$0xff] }
0x1c39   :  { %4723 = vmatprep.subr.bf16.mxu0 %v4722_v18 }
0x1c3b   :  { %v3387_v63 = vpop.permute.xlu1 %3386  ;;  %v3467_v29 = vpop.permute.xlu0 %3466 }
0x1c3c   :  { %4554 = vmatpush3.msra.mxu1 %v3387_v63  ;;  %v3487_v32 = vsel %vm302_vm4, %v5489_v38, %v3467_v29  ;;  %v4109_v29 = vld [vmem:[%s5749_s10 + $0xc0] sm:$0xff] }
0x1c3d   :  { %4731 = vmatprep.subr.bf16.mxu1 %v4730_v58 }
0x1c3e   :  { %v4877_v14 = vpop.eup %4876 }
0x1c3f   :  { %v3308_v1 = vmul.f32 %v4877_v14, %v4873_v3  ;;  %v3465_v27 = vpop.permute.xlu1 %3464  ;;  %v3475_v12 = vpop.permute.xlu0 %3474 }
0x1c40   :  { %v3486_v31 = vsel %vm302_vm4, %v5487_v34, %v3465_v27  ;;  %v3489_v33 = vsel %vm1644_vm7, %v3487_v32, %v3475_v12  ;;  %v4088_v34 = vld [vmem:[%s5745_s6 + $0x1] ss:$0 sm:$0xff]  ;;  %v4111_v12 = vld [vmem:[%s5749_s10 + $0xd0] sm:$0xff]  ;;  %v4114_v32 = vld [vmem:[%s5749_s10 + $0xe8] sm:$0xff] }
0x1c41   :  { %4551 = vmatmul.mubr.msk.f32.vlgmr.msra.gmra.mrb[20].mxu0 %vm302_vm4, %v3308_v1  ;;  %v4092_v1 = vld [vmem:[%s5746_s7 + $0x7] ss:$0 sm:$0xff] }
0x1c42   :  { %v4879_v9 = vpop.eup %4878  ;;  %4725 = vmatpush3.bf16.msra.mxu0 %v4722_v18  ;;  %v4103_v18 = vld [vmem:[%s5749_s10 + $0x90] sm:$0xff] }
0x1c43   :  { %v3309_v15 = vmul.f32 %v4879_v9, %v4875_v5  ;;  %4727 = vmatprep.subr.bf16.mxu0 %v4726_v21  ;;  %v3473_v30 = vpop.permute.xlu1 %3472  ;;  %v4742_v20 = vpack.c.bf16 %v4104_v19, %v4103_v18  ;;  %v3898_v18 = vld [vmem:[%s5752_s13 + $0x8] sm:$0xff] }
0x1c44   :  { %v3488_v60 = vsel %vm1644_vm7, %v3486_v31, %v3473_v30  ;;  %v4110_v30 = vld [vmem:[%s5749_s10 + $0xc8] sm:$0xff] }
0x1c45   :  { %4556 = vmatmul.mubr.msk.f32.vlgmr.msra.gmra.mrb[52].mxu1 %vm302_vm4, %v3309_v15  ;;  %v4754_v31 = vpack.c.bf16 %v4110_v30, %v4109_v29 }
0x1c46   :  { %4729 = vmatpush3.bf16.msra.mxu0 %v4726_v21  ;;  %4733 = vmatpush3.bf16.msra.mxu1 %v4730_v58  ;;  %v4105_v21 = vld [vmem:[%s5749_s10 + $0xa0] sm:$0xff] }
0x1c47   :  { %4735 = vmatprep.subr.bf16.mxu1 %v4734_v62  ;;  %4739 = vmatprep.subr.bf16.mxu0 %v4738_v2 }
0x1c4a   :  { %4737 = vmatpush3.bf16.msra.mxu1 %v4734_v62 }
0x1d14   :  { %v3382_v22 = vpop.f32.mrb[20].mxu0 }
0x1d15   :  { %3480 = vrot.lane.b32.xlu1 %v3382_v22, %s5768_s22  ;;  %v4552_v23 = vpop.f32.mrb[21].mxu0  ;;  %v4106_v22 = vld [vmem:[%s5749_s10 + $0xa8] sm:$0xff] }
0x1d16   :  { %v4746_v23 = vpack.c.bf16 %v4106_v22, %v4105_v21  ;;  %v3900_v21 = vld [vmem:[%s5752_s13 + $0x18] sm:$0xff] }
0x1d18   :  { %v3458_v24 = vpop.f32.mrb[52].mxu1 }
0x1d19   :  { %3482 = vrot.lane.b32.xlu0 %v3458_v24, %s5768_s22  ;;  %v4557_v26 = vpop.f32.mrb[53].mxu1  ;;  %v4107_v24 = vld [vmem:[%s5749_s10 + $0xb0] sm:$0xff] }
0x1d1a   :  { %v4108_v26 = vld [vmem:[%s5749_s10 + $0xb8] sm:$0xff] }
0x1d1b   :  { %v4750_v27 = vpack.c.bf16 %v4108_v26, %v4107_v24 }
0x1d87   :  { %v3481_v52 = vpop.permute.xlu1 %3480 }
0x1d88   :  { %v3490_v28 = vsel %vm1647_vm6, %v3488_v60, %v3481_v52  ;;  %v4112_v60 = vld [vmem:[%s5749_s10 + $0xd8] sm:$0xff] }
0x1d89   :  { %4566 = vmatprep.mubr.msk.f32.mxu0 %vm163_vm2, %v3490_v28  ;;  %v4758_v52 = vpack.c.bf16 %v4112_v60, %v4111_v12  ;;  %v4113_v28 = vld [vmem:[%s5749_s10 + $0xe0] sm:$0xff] }
0x1d8a   :  { %v4120_v12 = vld [vmem:[%s5751_s12] ss:$0 sm:$0xff] }
0x1d8b   :  { %v3483_v37 = vpop.permute.xlu0 %3482 }
0x1d8c   :  { %v3491_v39 = vsel %vm1647_vm6, %v3489_v33, %v3483_v37  ;;  %v4762_v33 = vpack.c.bf16 %v4114_v32, %v4113_v28  ;;  %v4115_v37 = vld [vmem:[%s5749_s10 + $0xf0] sm:$0xff]  ;;  %v4121_v32 = vld [vmem:[%s5751_s12 + $0x1] ss:$0 sm:$0xff] }
0x1d8d   :  { %4567 = vmatmul.mubr.msk.f32.vlgmr.msra.gmra.mrb[22].mxu0 %vm163_vm2, %v3491_v39  ;;  %v4116_v39 = vld [vmem:[%s5749_s10 + $0xf8] sm:$0xff] }
0x1d8e   :  { %4741 = vmatpush3.bf16.msra.mxu0 %v4738_v2  ;;  %v4118_v2 = vld [vmem:[%s5750_s11 + $0x1] ss:$0 sm:$0xff] }
0x1d8f   :  { %4743 = vmatprep.subr.bf16.mxu0 %v4742_v20 }
0x1d92   :  { %4745 = vmatpush3.bf16.msra.mxu0 %v4742_v20  ;;  %v3899_v20 = vld [vmem:[%s5752_s13 + $0x10] sm:$0xff] }
0x1d93   :  { %4747 = vmatprep.subr.bf16.mxu0 %v4746_v23  ;;  %v4774_v22 = vpack.c.bf16 %v3900_v21, %v3899_v20 }
0x1d96   :  { %4749 = vmatpush3.bf16.msra.mxu0 %v4746_v23 }
0x1d97   :  { %4751 = vmatprep.subr.bf16.mxu0 %v4750_v27 }
0x1d9a   :  { %4753 = vmatpush3.bf16.msra.mxu0 %v4750_v27 }
0x1d9b   :  { %4755 = vmatprep.subr.bf16.mxu0 %v4754_v31 }
0x1d9e   :  { %4757 = vmatpush3.bf16.msra.mxu0 %v4754_v31 }
0x1d9f   :  { %4759 = vmatprep.subr.bf16.mxu0 %v4758_v52 }
0x1da2   :  { %4761 = vmatpush3.bf16.msra.mxu0 %v4758_v52 }
0x1da3   :  { %4763 = vmatprep.subr.bf16.mxu0 %v4762_v33 }
0x1da6   :  { %4765 = vmatpush3.bf16.msra.mxu0 %v4762_v33 }
0x1e60   :  { %v4568_v40 = vpop.f32.mrb[22].mxu0 }
0x1e61   :  { %v3579_v41 = vadd.f32 %v4568_v40, %v5393_v25  ;;  %v3569_v42 = vpop.f32.mrb[23].mxu0  ;;  %v4766_v40 = vpack.c.bf16 %v4116_v39, %v4115_v37 }
0x1e62   :  { %v3578_v43 = vadd.f32 %v3569_v42, %v5395_v11 }
0x1e63   :  { %v5614_v44 = vadd.f32 %v4088_v34, %v3579_v41  ;;  %4767 = vmatprep.subr.bf16.mxu0 %v4766_v40 }
0x1e64   :  { %v5616_v38 = vadd.f32 %v4088_v34, %v3578_v43  ;;  %4769 = vmatpush3.bf16.msra.mxu0 %v4766_v40  ;;  %v4098_v34 = vld [vmem:[%s5748_s9 + $0x1] ss:$0 sm:$0xff] }
0x1e65   :  { %v3597_v45 = vsel %vm163_vm2, %v5614_v44, 0.0 }
0x1e66   :  { %3598 = vadd.xlane.f32.xlu0 %v3597_v45  ;;  %v3594_v46 = vsel %vm163_vm2, %v5616_v38, 0.0 }
0x1e67   :  { %3595 = vadd.xlane.f32.xlu1 %v3594_v46 }
0x1ef3   :  { %v3599_v47 = vpop.xlane.xlu0 %3598 }
0x1ef4   :  { %v3601_v48 = vmul.f32 0.03125, %v3599_v47  ;;  %v3596_v49 = vpop.xlane.xlu1 %3595 }
0x1ef5   :  { %v3600_v51 = vmul.f32 0.03125, %v3596_v49 }
0x1ef6   :  { %v3603_v25 = vsub.f32 %v5614_v44, %v3601_v48 }
0x1ef7   :  { %v3602_v11 = vsub.f32 %v5616_v38, %v3600_v51 }
0x1ef8   :  { %v3605_v53 = vmul.f32 %v3603_v25, %v3603_v25 }
0x1ef9   :  { %v3604_v54 = vmul.f32 %v3602_v11, %v3602_v11 }
0x1efa   :  { %v3609_v55 = vsel %vm163_vm2, %v3605_v53, 0.0 }
0x1efb   :  { %3610 = vadd.xlane.f32.xlu1 %v3609_v55  ;;  %v3606_v50 = vsel %vm163_vm2, %v3604_v54, 0.0 }
0x1efc   :  { %3607 = vadd.xlane.f32.xlu0 %v3606_v50 }
0x1f88   :  { %v3611_v36 = vpop.xlane.xlu1 %3610 }
0x1f89   :  { %v3613_v35 = vmul.f32 0.03125, %v3611_v36  ;;  %v3608_v3 = vpop.xlane.xlu0 %3607 }
0x1f8a   :  { %v3612_v4 = vmul.f32 0.03125, %v3608_v3 }
0x1f8b   :  { %v3615_v5 = vadd.f32 1e-05, %v3613_v35 }
0x1f8c   :  { %v3614_v6 = vadd.f32 1e-05, %v3612_v4 }
0x1f8d   :  { %4880 = vrsqrt.f32 %v3615_v5 }
0x1f8e   :  { %4882 = vrsqrt.f32 %v3614_v6 }
0x1f97   :  { %v4881_v17 = vpop.eup %4880 }
0x1f98   :  { %v4883_v10 = vpop.eup %4882  ;;  %v3619_v63 = vmul.f32 %v4881_v17, %v3603_v25 }
0x1f99   :  { %v3618_v14 = vmul.f32 %v4883_v10, %v3602_v11 }
0x1f9a   :  { %v3627_v9 = vmul.f32 %v4091_v8, %v3619_v63 }
0x1f9b   :  { %v3626_v15 = vmul.f32 %v4091_v8, %v3618_v14 }
0x1f9c   :  { %v3635_v16 = vadd.f32 %v4092_v1, %v3627_v9 }
0x1f9d   :  { %v3634_v13 = vadd.f32 %v4092_v1, %v3626_v15 }
0x1f9f   :  { %4577 = vmatprep.mubr.msk.f32.mxu1 %vm163_vm2, %v3634_v13 }
0x1fa0   :  { %4578 = vmatmul.mubr.msk.f32.vlgmr.msra.gmra.mrb[54].mxu1 %vm163_vm2, %v3635_v16  ;;  %v3897_v16 = vld [vmem:[%s5752_s13] sm:$0xff] }
0x1fa1   :  { %v4770_v19 = vpack.c.bf16 %v3898_v18, %v3897_v16 }
0x1fa3   :  { %4771 = vmatprep.subr.bf16.mxu1 %v4770_v19 }
0x1fa4   :  { %4773 = vmatpush3.bf16.msra.mxu1 %v4770_v19 }
0x1fa5   :  { %4775 = vmatprep.subr.bf16.mxu1 %v4774_v22 }
0x1fa8   :  { %4777 = vmatpush3.bf16.msra.mxu1 %v4774_v22 }
0x2073   :  { %v4579_v41 = vpop.f32.mrb[54].mxu1 }
0x2074   :  { %v3727_v42 = vadd.f32 %v4579_v41, %v4098_v34  ;;  %v3721_v43 = vpop.f32.mrb[55].mxu1 }
0x2075   :  { %v3722_v45 = vadd.f32 %v4098_v34, %v3721_v43 }
0x2076   :  { %v3733_v46 = vmul.f32 0.044715, %v3727_v42  ;;  %v3731_v61 = vmul.f32 0.5, %v3727_v42 }
0x2077   :  { %v3732_v47 = vmul.f32 0.044715, %v3722_v45  ;;  %v3730_v58 = vmul.f32 0.5, %v3722_v45 }
0x2078   :  { %v3735_v48 = vmul.f32 %v3733_v46, %v3727_v42 }
0x2079   :  { %v3734_v49 = vmul.f32 %v3732_v47, %v3722_v45 }
0x207a   :  { %v3737_v51 = vmul.f32 %v3735_v48, %v3727_v42 }
0x207b   :  { %v3736_v25 = vmul.f32 %v3734_v49, %v3722_v45 }
0x207c   :  { %v3739_v11 = vadd.f32 %v3737_v51, %v3727_v42 }
0x207d   :  { %v3738_v53 = vadd.f32 %v3736_v25, %v3722_v45 }
0x207e   :  { %v3741_v54 = vmul.f32 0.7978846, %v3739_v11 }
0x207f   :  { %v3740_v55 = vmul.f32 0.7978846, %v3738_v53 }
0x2080   :  { %4884 = vtanh.f32 %v3741_v54 }
0x2081   :  { %4886 = vtanh.f32 %v3740_v55 }
0x208a   :  { %v4885_v50 = vpop.eup %4884 }
0x208b   :  { %v4887_v56 = vpop.eup %4886  ;;  %v3745_v57 = vadd.f32 1.0, %v4885_v50 }
0x208c   :  { %v3744_v59 = vadd.f32 1.0, %v4887_v56 }
0x208d   :  { %v3747_v7 = vmul.f32 %v3745_v57, %v3731_v61 }
0x208e   :  { %v3746_v62 = vmul.f32 %v3744_v59, %v3730_v58 }
0x2090   :  { %4612 = vmatprep.mubr.f32.mxu0 %v3746_v62 }
0x2091   :  { %4613 = vmatmul.mubr.f32.vlgmr.msra.gmra.mrb[24].mxu0 %v3747_v7 }
0x2164   :  { %v4614_v0 = vpop.f32.mrb[24].mxu0 }
0x2165   :  { %v3841_v36 = vadd.f32 %v4614_v0, %v5614_v44  ;;  %v3831_v35 = vpop.f32.mrb[25].mxu0 }
0x2166   :  { %v3840_v3 = vadd.f32 %v3831_v35, %v5616_v38 }
0x2167   :  { %v3851_v4 = vadd.f32 %v4118_v2, %v3841_v36 }
0x2168   :  { %v3850_v5 = vadd.f32 %v4118_v2, %v3840_v3 }
0x2169   :  { %v3858_v6 = vsel %vm163_vm2, %v3851_v4, 0.0 }
0x216a   :  { %3859 = vadd.xlane.f32.xlu1 %v3858_v6  ;;  %v3855_v17 = vsel %vm163_vm2, %v3850_v5, 0.0 }
0x216b   :  { %3856 = vadd.xlane.f32.xlu0 %v3855_v17 }
0x21f7   :  { %v3860_v8 = vpop.xlane.xlu1 %3859 }
0x21f8   :  { %v3862_v10 = vmul.f32 0.03125, %v3860_v8  ;;  %v3857_v63 = vpop.xlane.xlu0 %3856 }
0x21f9   :  { %v3861_v14 = vmul.f32 0.03125, %v3857_v63 }
0x21fa   :  { %v3864_v1 = vsub.f32 %v3851_v4, %v3862_v10 }
0x21fb   :  { %v3863_v9 = vsub.f32 %v3850_v5, %v3861_v14 }
0x21fc   :  { %v3866_v15 = vmul.f32 %v3864_v1, %v3864_v1 }
0x21fd   :  { %v3865_v13 = vmul.f32 %v3863_v9, %v3863_v9 }
0x21fe   :  { %v3870_v44 = vsel %vm163_vm2, %v3866_v15, 0.0 }
0x21ff   :  { %3871 = vadd.xlane.f32.xlu1 %v3870_v44  ;;  %v3867_v38 = vsel %vm163_vm2, %v3865_v13, 0.0 }
0x2200   :  { %3868 = vadd.xlane.f32.xlu0 %v3867_v38 }
0x228c   :  { %v3872_v23 = vpop.xlane.xlu1 %3871 }
0x228d   :  { %v3874_v24 = vmul.f32 0.03125, %v3872_v23  ;;  %v3869_v26 = vpop.xlane.xlu0 %3868 }
0x228e   :  { %v3873_v27 = vmul.f32 0.03125, %v3869_v26 }
0x228f   :  { %v3876_v29 = vadd.f32 1e-05, %v3874_v24 }
0x2290   :  { %v3875_v30 = vadd.f32 1e-05, %v3873_v27 }
0x2291   :  { %4888 = vrsqrt.f32 %v3876_v29 }
0x2292   :  { %4890 = vrsqrt.f32 %v3875_v30 }
0x229b   :  { %v4889_v31 = vpop.eup %4888 }
0x229c   :  { %v4891_v60 = vpop.eup %4890  ;;  %v3880_v52 = vmul.f32 %v4889_v31, %v3864_v1 }
0x229d   :  { %v3879_v28 = vmul.f32 %v4891_v60, %v3863_v9 }
0x229e   :  { %v3888_v33 = vmul.f32 %v4120_v12, %v3880_v52 }
0x229f   :  { %v3887_v37 = vmul.f32 %v4120_v12, %v3879_v28 }
0x22a0   :  { %v3896_v40 = vadd.f32 %v4121_v32, %v3888_v33 }
0x22a1   :  { %v3895_v39 = vadd.f32 %v4121_v32, %v3887_v37 }
0x22a3   :  { %4623 = vmatprep.mubr.msk.f32.mxu1 %vm163_vm2, %v3895_v39 }
0x22a4   :  { %4624 = vmatmul.mubr.msk.f32.vlgmr.msra.gmra.mrb[56].mxu1 %vm163_vm2, %v3896_v40 }
0x2377   :  { %v4625_v34 = vpop.f32.mrb[56].mxu1 }
0x2378   :  { %3983 = vst [vmem:[#allocation2 + $0x8] sm:$0xff] %v4625_v34  ;;  %v3973_v41 = vpop.f32.mrb[57].mxu1 }
0x2379   :  { %3982 = vst [vmem:[#allocation2] sm:$0xff] %v3973_v41 }
0x237a   :  { %4903 = shalt.err (!%p4900_p4)
}
0x237b   :  { %s4904_s8 = scalar_lea.hbm %s5753_s14, 256 }
0x237c   :  { %p4905_p5 = scmp.ne.s32.totalorder %s5753_s14, %s4904_s8  ;;  %p4908_p6 = scmp.lt.u32.totalorder %s4904_s8, %s5753_s14 }
0x237e   :  { %p4910_p7 = pnand %p4908_p6, %p4905_p5 }
0x2380   :  { %4913 = shalt.err (!%p4910_p7)
}
0x2381   :  { %s4936_s18 = smov 128  }
0x2382   :  { %3995 = dma.vmem_to_hbm [thread:$0]  %s3990_s29, 256, %s5753_s14, [#allocation3], %s4936_s18, %s4936_s18, %s5766_s30  }
0x2383   :  { %4914 = dma.done.wait [#allocation3], 256  }
0x2384   :  { %4915 = vsyncadd [#allocation3], 4294967040 }
0x2385   :  { %3999 = vsyncpa [#allocation3], 1 }

</bundles_post_ra>
